<compile_context>
chip_gen: v7x
topology: tpu7x:2x2x1
jax: 0.10.0
libtpu: 0.0.40
codegen_flags: <defaults>
</compile_context>

<pallas_src>
import jax
import jax.numpy as jnp
from jax.experimental import pallas as pl
from jax.experimental.pallas import tpu as pltpu

# ----------------------------- configuration --------------------------------
DIM = 32                     # in_features == out_features
HIDDEN = int(DIM * 4.0)      # hidden_features (mlp_ratio = 4)
B, H_IMG, W_IMG = 2, 16, 16
BAND = 4                     # dwconv/fc2 row band (f32 accumulator = 8 vregs)
PAD_W = 8                    # zero strip width on the right of the halo scratch


# ------------------------------- kernel --------------------------------------
def _gelu_tanh(y):
    # tanh-approx GELU: the tanh runs on the otherwise idle EUP slot instead of
    # ~15 VALU ops/elem for the erf polynomial.  |gelu_tanh - gelu_erf| <= ~3e-3,
    # well inside the test tolerance (bf16 MXU rounding dominates anyway).
    c = 0.7978845608028654  # sqrt(2/pi)
    return 0.5 * y * (1.0 + jnp.tanh(c * (y + 0.044715 * (y * y * y))))


def _mlp_fused_kernel(x_ref, w1_ref, b1_ref, wdw_ref, bdw_ref, w2_ref, b2_ref,
                      o_ref, hpad_ref):
    """One image per grid step: fc1 + GELU + ResDWC(3x3) + fc2, all VMEM-resident."""
    hid = w1_ref.shape[1]
    H = hpad_ref.shape[0] - 2
    Wp = hpad_ref.shape[1]
    W = Wp - PAD_W

    # ---- fc1 (1x1 conv == token matmul; bf16 operands, f32 accumulation) ----
    h = jnp.dot(x_ref[0], w1_ref[...], preferred_element_type=jnp.float32)
    h = _gelu_tanh(h + b1_ref[0].astype(jnp.float32))          # (H*W, hid) f32

    # ---- stage hidden activation into the halo'd VMEM scratch ---------------
    # Interior rows 1..H live at columns [0, W) (8-aligned, unmasked stores).
    # Columns [W, Wp) are a zero strip: it is the right halo and -- through the
    # wrap-around of the sublane roll below -- also the left halo.  Only the
    # halo strips are zeroed; the interior is fully overwritten every step.
    hpad_ref[0] = jnp.zeros((Wp, hid), jnp.float32)
    hpad_ref[H + 1] = jnp.zeros((Wp, hid), jnp.float32)
    hpad_ref[1:H + 1, W:Wp, :] = jnp.zeros((H, PAD_W, hid), jnp.float32)
    hpad_ref[1:H + 1, 0:W, :] = h.reshape(H, W, hid)

    # ---- hoisted small operands ----------------------------------------------
    wdw = wdw_ref[...].astype(jnp.float32)   # (9, hid); center tap has +1 folded in
    bdw = bdw_ref[0].astype(jnp.float32)     # (hid,)
    w2 = w2_ref[...]                         # (hid, cout) bf16
    b2 = b2_ref[0].astype(jnp.float32)       # (cout,)

    # ---- ResDWC (residual folded into center tap) + fc2, row-banded ----------
    # Each band keeps its f32 accumulator in registers and feeds it straight
    # into a per-band fc2 matmul -- no accumulator scratch round-trips.
    @pl.loop(0, H // BAND)
    def _(bi):
        i0 = pl.multiple_of(bi * BAND, BAND)
        acc = jnp.broadcast_to(bdw, (BAND, W, hid))            # dwconv bias
        for p in range(3):                                     # 3 kernel rows
            slab = hpad_ref[pl.ds(i0 + p, BAND)]               # (BAND, Wp, hid)
            flat = slab.reshape(BAND * Wp, hid)
            # XLU sublane rotates give the +/-1 column shifts; the kept
            # [:, :W, :] window only ever picks up zero-strip columns from the
            # wrap-around, so this matches zero padding exactly.
            lft = pltpu.roll(flat, 1, axis=0).reshape(BAND, Wp, hid)[:, 0:W, :]
            rgt = pltpu.roll(flat, BAND * Wp - 1, axis=0).reshape(BAND, Wp, hid)[:, 0:W, :]
            ctr = slab[:, 0:W, :]
            acc = (acc + lft * wdw[3 * p + 0]
                   + ctr * wdw[3 * p + 1]
                   + rgt * wdw[3 * p + 2])
        # ---- fc2 (1x1 conv == token matmul) on the finished band -------------
        y = jnp.dot(acc.reshape(BAND * W, hid).astype(jnp.bfloat16), w2,
                    preferred_element_type=jnp.float32) + b2
        row0 = pl.multiple_of(i0 * W, BAND * W)
        o_ref[0, pl.ds(row0, BAND * W), :] = y.astype(o_ref.dtype)


# ------------------------------ wrapper ---------------------------------------
def mlp_forward(x_nchw, params):
    """Forward of the PyTorch Mlp module.  I/O is NCHW float32 like the reference."""
    Bn, cin, H, W = x_nchw.shape
    hid = params["fc1_w"].shape[1]
    cout = params["fc2_w"].shape[1]
    assert H % BAND == 0 and W % 8 == 0
    HW = H * W

    # NCHW -> (B, H*W, C) tokens: channels sit on the 128-lane axis; bf16 feed
    # halves the input DMA (matmuls accumulate in f32 on the MXU).
    x_tok = jnp.transpose(x_nchw, (0, 2, 3, 1)).reshape(Bn, HW, cin).astype(jnp.bfloat16)

    # Fold the ResDWC "+h" residual into the depthwise center tap (host-side).
    dw_w = params["dw_w"].at[4].add(1.0)

    y = pl.pallas_call(
        _mlp_fused_kernel,
        out_shape=jax.ShapeDtypeStruct((Bn, HW, cout), jnp.float32),
        grid=(Bn,),
        in_specs=[
            pl.BlockSpec((1, HW, cin), lambda b: (b, 0, 0)),   # tokens (bf16)
            pl.BlockSpec((cin, hid), lambda b: (0, 0)),        # fc1 weight (bf16)
            pl.BlockSpec((1, hid), lambda b: (0, 0)),          # fc1 bias
            pl.BlockSpec((9, hid), lambda b: (0, 0)),          # dw 3x3 weight (+1 center)
            pl.BlockSpec((1, hid), lambda b: (0, 0)),          # dw bias
            pl.BlockSpec((hid, cout), lambda b: (0, 0)),       # fc2 weight (bf16)
            pl.BlockSpec((1, cout), lambda b: (0, 0)),         # fc2 bias
        ],
        out_specs=pl.BlockSpec((1, HW, cout), lambda b: (b, 0, 0)),
        scratch_shapes=[
            pltpu.VMEM((H + 2, W + PAD_W, hid), jnp.float32),  # halo'd hidden act
        ],
        compiler_params=pltpu.CompilerParams(dimension_semantics=("parallel",)),
    )(x_tok,
      params["fc1_w"].astype(jnp.bfloat16), params["fc1_b"].reshape(1, -1),
      dw_w, params["dw_b"].reshape(1, -1),
      params["fc2_w"].astype(jnp.bfloat16), params["fc2_b"].reshape(1, -1))

    return jnp.transpose(y.reshape(Bn, H, W, cout), (0, 3, 1, 2))   # -> NCHW


# ----------------------- pure-JAX f32 reference (check) -----------------------
def mlp_reference(x_nchw, params):
    x = jnp.transpose(x_nchw, (0, 2, 3, 1)).astype(jnp.float32)
    H, W = x.shape[1], x.shape[2]
    h = jnp.einsum("bhwc,cd->bhwd", x, params["fc1_w"]) + params["fc1_b"]
    h = jax.nn.gelu(h, approximate=False)
    hp = jnp.pad(h, ((0, 0), (1, 1), (1, 1), (0, 0)))
    conv = jnp.zeros_like(h) + params["dw_b"]
    for k in range(9):
        p, q = divmod(k, 3)
        conv = conv + hp[:, p:p + H, q:q + W, :] * params["dw_w"][k]
    h = h + conv                                             # ResDWC residual
    y = jnp.einsum("bhwd,dc->bhwc", h, params["fc2_w"]) + params["fc2_b"]
    return jnp.transpose(y, (0, 3, 1, 2))


# ------------------------------ parameters ------------------------------------
def init_params(key, cin, hidden, cout):
    ks = jax.random.split(key, 6)

    def rn(k, shape, s=0.1):
        return s * jax.random.normal(k, shape, jnp.float32)

    # Weight conventions vs PyTorch:
    #   1x1 convs stored pre-transposed: (C_in, C_out) == weight.reshape(Cout, Cin).T
    #   depthwise 3x3: dw_w[ky*3+kx, c]  == conv.weight[c, 0, ky, kx]
    return dict(
        fc1_w=rn(ks[0], (cin, hidden)), fc1_b=rn(ks[1], (hidden,)),
        dw_w=rn(ks[2], (9, hidden)),    dw_b=rn(ks[3], (hidden,)),
        fc2_w=rn(ks[4], (hidden, cout)), fc2_b=rn(ks[5], (cout,)),
    )


# --------------------------------- main ----------------------------------------
if __name__ == "__main__":
    key = jax.random.PRNGKey(0)
    kp, kx = jax.random.split(key)
    params = init_params(kp, DIM, HIDDEN, DIM)
    x = jax.random.normal(kx, (B, DIM, H_IMG, W_IMG), jnp.float32)   # NCHW, like PyTorch

    fwd = jax.jit(mlp_forward)
    y = fwd(x, params)
    jax.block_until_ready(y)

    assert y.shape == (B, DIM, H_IMG, W_IMG) and y.dtype == jnp.float32
    assert bool(jnp.all(jnp.isfinite(y)))

    # Loose tolerance vs the pure-f32 / exact-erf reference: kernel matmuls use
    # bf16 MXU operands (f32 accumulation) and GELU uses the tanh approximation.
    y_ref = jax.jit(mlp_reference)(x, params)
    err = float(jnp.max(jnp.abs(y - y_ref)))
    assert err < 0.15, f"max abs err {err}"

    print("KERNEL_OK")
</pallas_src>

<mosaic_0001>
module attributes {stable_mosaic.version = 11 : i64} {
  func.func @_mlp_fused_kernel(%arg0: i32, %arg1: memref<1x256x32xbf16, #tpu.memory_space<vmem>>, %arg2: memref<32x128xbf16, #tpu.memory_space<vmem>>, %arg3: memref<1x128xf32, #tpu.memory_space<vmem>>, %arg4: memref<9x128xf32, #tpu.memory_space<vmem>>, %arg5: memref<1x128xf32, #tpu.memory_space<vmem>>, %arg6: memref<128x32xbf16, #tpu.memory_space<vmem>>, %arg7: memref<1x32xf32, #tpu.memory_space<vmem>>, %arg8: memref<1x256x32xf32, #tpu.memory_space<vmem>>, %arg9: memref<18x24x128xf32, #tpu.memory_space<vmem>>) attributes {dimension_semantics = [#tpu.dimension_semantics<parallel>], iteration_bounds = array<i64: 2>, scalar_prefetch = 0 : i64, scratch_operands = 1 : i64, tpu.core_type = #tpu.core_type<tc>, window_params = [{transform_indices = @transform_0, window_bounds = array<i64: 1, 256, 32>}, {pipeline_mode = #tpu.pipeline_mode<synchronous>, transform_indices = @transform_1, window_bounds = array<i64: 32, 128>}, {pipeline_mode = #tpu.pipeline_mode<synchronous>, transform_indices = @transform_2, window_bounds = array<i64: 1, 128>}, {pipeline_mode = #tpu.pipeline_mode<synchronous>, transform_indices = @transform_3, window_bounds = array<i64: 9, 128>}, {pipeline_mode = #tpu.pipeline_mode<synchronous>, transform_indices = @transform_4, window_bounds = array<i64: 1, 128>}, {pipeline_mode = #tpu.pipeline_mode<synchronous>, transform_indices = @transform_5, window_bounds = array<i64: 128, 32>}, {pipeline_mode = #tpu.pipeline_mode<synchronous>, transform_indices = @transform_6, window_bounds = array<i64: 1, 32>}, {transform_indices = @transform_7, window_bounds = array<i64: 1, 256, 32>}]} {
    %c0 = arith.constant 0 : index
    %c0_0 = arith.constant 0 : index
    %c0_1 = arith.constant 0 : index
    %0 = vector.load %arg1[%c0, %c0_0, %c0_1] : memref<1x256x32xbf16, #tpu.memory_space<vmem>>, vector<1x256x32xbf16>
    %1 = vector.shape_cast %0 : vector<1x256x32xbf16> to vector<256x32xbf16>
    %c0_2 = arith.constant 0 : index
    %c0_3 = arith.constant 0 : index
    %2 = vector.load %arg2[%c0_2, %c0_3] : memref<32x128xbf16, #tpu.memory_space<vmem>>, vector<32x128xbf16>
    %cst = arith.constant dense<0.000000e+00> : vector<256x128xf32>
    %3 = tpu.matmul %1, %2, %cst {dimension_numbers = #tpu.dot_dimension_numbers<[1], [0], [0], [1], [0, 0, 1, 1], [], []>} : vector<256x32xbf16>, vector<32x128xbf16>, vector<256x128xf32> -> vector<256x128xf32>
    %c0_4 = arith.constant 0 : index
    %c0_5 = arith.constant 0 : index
    %4 = vector.load %arg3[%c0_4, %c0_5] : memref<1x128xf32, #tpu.memory_space<vmem>>, vector<1x128xf32>
    %5 = vector.shape_cast %4 : vector<1x128xf32> to vector<128xf32>
    %6 = vector.shape_cast %5 : vector<128xf32> to vector<1x128xf32>
    %7 = vector.broadcast %6 : vector<1x128xf32> to vector<256x128xf32>
    %8 = arith.addf %3, %7 : vector<256x128xf32>
    %cst_6 = arith.constant 5.000000e-01 : f32
    %9 = vector.broadcast %cst_6 : f32 to vector<256x128xf32>
    %10 = arith.mulf %9, %8 : vector<256x128xf32>
    %11 = arith.mulf %8, %8 : vector<256x128xf32>
    %12 = arith.mulf %11, %8 : vector<256x128xf32>
    %cst_7 = arith.constant 4.471500e-02 : f32
    %13 = vector.broadcast %cst_7 : f32 to vector<256x128xf32>
    %14 = arith.mulf %13, %12 : vector<256x128xf32>
    %15 = arith.addf %8, %14 : vector<256x128xf32>
    %cst_8 = arith.constant 0.797884583 : f32
    %16 = vector.broadcast %cst_8 : f32 to vector<256x128xf32>
    %17 = arith.mulf %16, %15 : vector<256x128xf32>
    %18 = math.tanh %17 : vector<256x128xf32>
    %cst_9 = arith.constant 1.000000e+00 : f32
    %19 = vector.broadcast %cst_9 : f32 to vector<256x128xf32>
    %20 = arith.addf %19, %18 : vector<256x128xf32>
    %21 = arith.mulf %10, %20 : vector<256x128xf32>
    %cst_10 = arith.constant 0.000000e+00 : f32
    %22 = vector.broadcast %cst_10 : f32 to vector<24x128xf32>
    %c0_11 = arith.constant 0 : index
    %c0_12 = arith.constant 0 : index
    %c0_13 = arith.constant 0 : index
    %23 = vector.load %arg9[%c0_11, %c0_12, %c0_13] : memref<18x24x128xf32, #tpu.memory_space<vmem>>, vector<1x24x128xf32>
    %24 = vector.shape_cast %23 : vector<1x24x128xf32> to vector<24x128xf32>
    %25 = vector.shape_cast %22 : vector<24x128xf32> to vector<1x24x128xf32>
    tpu.vector_store %arg9[%c0_11, %c0_12, %c0_13], %25 {strides = array<i32>} : memref<18x24x128xf32, #tpu.memory_space<vmem>>, vector<1x24x128xf32>,
    %cst_14 = arith.constant 0.000000e+00 : f32
    %26 = vector.broadcast %cst_14 : f32 to vector<24x128xf32>
    %c17 = arith.constant 17 : index
    %c0_15 = arith.constant 0 : index
    %c0_16 = arith.constant 0 : index
    %27 = vector.load %arg9[%c17, %c0_15, %c0_16] : memref<18x24x128xf32, #tpu.memory_space<vmem>>, vector<1x24x128xf32>
    %28 = vector.shape_cast %27 : vector<1x24x128xf32> to vector<24x128xf32>
    %29 = vector.shape_cast %26 : vector<24x128xf32> to vector<1x24x128xf32>
    tpu.vector_store %arg9[%c17, %c0_15, %c0_16], %29 {strides = array<i32>} : memref<18x24x128xf32, #tpu.memory_space<vmem>>, vector<1x24x128xf32>,
    %cst_17 = arith.constant 0.000000e+00 : f32
    %30 = vector.broadcast %cst_17 : f32 to vector<16x8x128xf32>
    %c1 = arith.constant 1 : index
    %c16 = arith.constant 16 : index
    %c0_18 = arith.constant 0 : index
    %31 = vector.load %arg9[%c1, %c16, %c0_18] : memref<18x24x128xf32, #tpu.memory_space<vmem>>, vector<16x8x128xf32>
    tpu.vector_store %arg9[%c1, %c16, %c0_18], %30 {strides = array<i32>} : memref<18x24x128xf32, #tpu.memory_space<vmem>>, vector<16x8x128xf32>,
    %32 = vector.shape_cast %21 : vector<256x128xf32> to vector<16x16x128xf32>
    %c1_19 = arith.constant 1 : index
    %c0_20 = arith.constant 0 : index
    %c0_21 = arith.constant 0 : index
    %33 = vector.load %arg9[%c1_19, %c0_20, %c0_21] : memref<18x24x128xf32, #tpu.memory_space<vmem>>, vector<16x16x128xf32>
    tpu.vector_store %arg9[%c1_19, %c0_20, %c0_21], %32 {strides = array<i32>} : memref<18x24x128xf32, #tpu.memory_space<vmem>>, vector<16x16x128xf32>,
    %c0_22 = arith.constant 0 : index
    %c0_23 = arith.constant 0 : index
    %34 = vector.load %arg4[%c0_22, %c0_23] : memref<9x128xf32, #tpu.memory_space<vmem>>, vector<9x128xf32>
    %c0_24 = arith.constant 0 : index
    %c0_25 = arith.constant 0 : index
    %35 = vector.load %arg5[%c0_24, %c0_25] : memref<1x128xf32, #tpu.memory_space<vmem>>, vector<1x128xf32>
    %36 = vector.shape_cast %35 : vector<1x128xf32> to vector<128xf32>
    %c0_26 = arith.constant 0 : index
    %c0_27 = arith.constant 0 : index
    %37 = vector.load %arg6[%c0_26, %c0_27] : memref<128x32xbf16, #tpu.memory_space<vmem>>, vector<128x32xbf16>
    %c0_28 = arith.constant 0 : index
    %c0_29 = arith.constant 0 : index
    %38 = vector.load %arg7[%c0_28, %c0_29] : memref<1x32xf32, #tpu.memory_space<vmem>>, vector<1x32xf32>
    %39 = vector.shape_cast %38 : vector<1x32xf32> to vector<32xf32>
    %c0_i32 = arith.constant 0 : i32
    %c4_i32 = arith.constant 4 : i32
    %40 = arith.addi %c0_i32, %c4_i32 : i32
    %c1_i32 = arith.constant 1 : i32
    scf.for %arg10 = %c0_i32 to %40 step %c1_i32  : i32 {
      %c1_i32_31 = arith.constant 1 : i32
      %41 = arith.muli %arg10, %c1_i32_31 : i32
      %c0_i32_32 = arith.constant 0 : i32
      %42 = arith.addi %c0_i32_32, %41 : i32
      %c4_i32_33 = arith.constant 4 : i32
      %43 = arith.muli %42, %c4_i32_33 : i32
      %44 = tpu.assume_multiple %43, 4 : i32
      %45 = vector.shape_cast %36 : vector<128xf32> to vector<1x1x128xf32>
      %46 = vector.broadcast %45 : vector<1x1x128xf32> to vector<4x16x128xf32>
      %c0_i32_34 = arith.constant 0 : i32
      %47 = arith.addi %44, %c0_i32_34 : i32
      %48 = arith.index_cast %47 : i32 to index
      %c0_35 = arith.constant 0 : index
      %c0_36 = arith.constant 0 : index
      %49 = vector.load %arg9[%48, %c0_35, %c0_36] : memref<18x24x128xf32, #tpu.memory_space<vmem>>, vector<4x24x128xf32>
      %50 = vector.shape_cast %49 : vector<4x24x128xf32> to vector<96x128xf32>
      %c1_i32_37 = arith.constant 1 : i32
      %51 = tpu.dynamic_rotate %50 by %c1_i32_37 dim 0 : vector<96x128xf32>, i32 -> vector<96x128xf32>
      %52 = vector.shape_cast %51 : vector<96x128xf32> to vector<4x24x128xf32>
      %53 = vector.extract_strided_slice %52 {offsets = [0, 0, 0], sizes = [4, 16, 128], strides = [1, 1, 1]} : vector<4x24x128xf32> to vector<4x16x128xf32>
      %c95_i32 = arith.constant 95 : i32
      %54 = tpu.dynamic_rotate %50 by %c95_i32 dim 0 : vector<96x128xf32>, i32 -> vector<96x128xf32>
      %55 = vector.shape_cast %54 : vector<96x128xf32> to vector<4x24x128xf32>
      %56 = vector.extract_strided_slice %55 {offsets = [0, 0, 0], sizes = [4, 16, 128], strides = [1, 1, 1]} : vector<4x24x128xf32> to vector<4x16x128xf32>
      %57 = vector.extract_strided_slice %49 {offsets = [0, 0, 0], sizes = [4, 16, 128], strides = [1, 1, 1]} : vector<4x24x128xf32> to vector<4x16x128xf32>
      %58 = vector.extract_strided_slice %34 {offsets = [0, 0], sizes = [1, 128], strides = [1, 1]} : vector<9x128xf32> to vector<1x128xf32>
      %59 = vector.shape_cast %58 : vector<1x128xf32> to vector<128xf32>
      %60 = vector.shape_cast %59 : vector<128xf32> to vector<1x1x128xf32>
      %61 = vector.broadcast %60 : vector<1x1x128xf32> to vector<4x16x128xf32>
      %62 = arith.mulf %53, %61 : vector<4x16x128xf32>
      %63 = arith.addf %46, %62 : vector<4x16x128xf32>
      %64 = vector.extract_strided_slice %34 {offsets = [1, 0], sizes = [1, 128], strides = [1, 1]} : vector<9x128xf32> to vector<1x128xf32>
      %65 = vector.shape_cast %64 : vector<1x128xf32> to vector<128xf32>
      %66 = vector.shape_cast %65 : vector<128xf32> to vector<1x1x128xf32>
      %67 = vector.broadcast %66 : vector<1x1x128xf32> to vector<4x16x128xf32>
      %68 = arith.mulf %57, %67 : vector<4x16x128xf32>
      %69 = arith.addf %63, %68 : vector<4x16x128xf32>
      %70 = vector.extract_strided_slice %34 {offsets = [2, 0], sizes = [1, 128], strides = [1, 1]} : vector<9x128xf32> to vector<1x128xf32>
      %71 = vector.shape_cast %70 : vector<1x128xf32> to vector<128xf32>
      %72 = vector.shape_cast %71 : vector<128xf32> to vector<1x1x128xf32>
      %73 = vector.broadcast %72 : vector<1x1x128xf32> to vector<4x16x128xf32>
      %74 = arith.mulf %56, %73 : vector<4x16x128xf32>
      %75 = arith.addf %69, %74 : vector<4x16x128xf32>
      %c1_i32_38 = arith.constant 1 : i32
      %76 = arith.addi %44, %c1_i32_38 : i32
      %77 = arith.index_cast %76 : i32 to index
      %c0_39 = arith.constant 0 : index
      %c0_40 = arith.constant 0 : index
      %78 = vector.load %arg9[%77, %c0_39, %c0_40] : memref<18x24x128xf32, #tpu.memory_space<vmem>>, vector<4x24x128xf32>
      %79 = vector.shape_cast %78 : vector<4x24x128xf32> to vector<96x128xf32>
      %c1_i32_41 = arith.constant 1 : i32
      %80 = tpu.dynamic_rotate %79 by %c1_i32_41 dim 0 : vector<96x128xf32>, i32 -> vector<96x128xf32>
      %81 = vector.shape_cast %80 : vector<96x128xf32> to vector<4x24x128xf32>
      %82 = vector.extract_strided_slice %81 {offsets = [0, 0, 0], sizes = [4, 16, 128], strides = [1, 1, 1]} : vector<4x24x128xf32> to vector<4x16x128xf32>
      %c95_i32_42 = arith.constant 95 : i32
      %83 = tpu.dynamic_rotate %79 by %c95_i32_42 dim 0 : vector<96x128xf32>, i32 -> vector<96x128xf32>
      %84 = vector.shape_cast %83 : vector<96x128xf32> to vector<4x24x128xf32>
      %85 = vector.extract_strided_slice %84 {offsets = [0, 0, 0], sizes = [4, 16, 128], strides = [1, 1, 1]} : vector<4x24x128xf32> to vector<4x16x128xf32>
      %86 = vector.extract_strided_slice %78 {offsets = [0, 0, 0], sizes = [4, 16, 128], strides = [1, 1, 1]} : vector<4x24x128xf32> to vector<4x16x128xf32>
      %87 = vector.extract_strided_slice %34 {offsets = [3, 0], sizes = [1, 128], strides = [1, 1]} : vector<9x128xf32> to vector<1x128xf32>
      %88 = vector.shape_cast %87 : vector<1x128xf32> to vector<128xf32>
      %89 = vector.shape_cast %88 : vector<128xf32> to vector<1x1x128xf32>
      %90 = vector.broadcast %89 : vector<1x1x128xf32> to vector<4x16x128xf32>
      %91 = arith.mulf %82, %90 : vector<4x16x128xf32>
      %92 = arith.addf %75, %91 : vector<4x16x128xf32>
      %93 = vector.extract_strided_slice %34 {offsets = [4, 0], sizes = [1, 128], strides = [1, 1]} : vector<9x128xf32> to vector<1x128xf32>
      %94 = vector.shape_cast %93 : vector<1x128xf32> to vector<128xf32>
      %95 = vector.shape_cast %94 : vector<128xf32> to vector<1x1x128xf32>
      %96 = vector.broadcast %95 : vector<1x1x128xf32> to vector<4x16x128xf32>
      %97 = arith.mulf %86, %96 : vector<4x16x128xf32>
      %98 = arith.addf %92, %97 : vector<4x16x128xf32>
      %99 = vector.extract_strided_slice %34 {offsets = [5, 0], sizes = [1, 128], strides = [1, 1]} : vector<9x128xf32> to vector<1x128xf32>
      %100 = vector.shape_cast %99 : vector<1x128xf32> to vector<128xf32>
      %101 = vector.shape_cast %100 : vector<128xf32> to vector<1x1x128xf32>
      %102 = vector.broadcast %101 : vector<1x1x128xf32> to vector<4x16x128xf32>
      %103 = arith.mulf %85, %102 : vector<4x16x128xf32>
      %104 = arith.addf %98, %103 : vector<4x16x128xf32>
      %c2_i32 = arith.constant 2 : i32
      %105 = arith.addi %44, %c2_i32 : i32
      %106 = arith.index_cast %105 : i32 to index
      %c0_43 = arith.constant 0 : index
      %c0_44 = arith.constant 0 : index
      %107 = vector.load %arg9[%106, %c0_43, %c0_44] : memref<18x24x128xf32, #tpu.memory_space<vmem>>, vector<4x24x128xf32>
      %108 = vector.shape_cast %107 : vector<4x24x128xf32> to vector<96x128xf32>
      %c1_i32_45 = arith.constant 1 : i32
      %109 = tpu.dynamic_rotate %108 by %c1_i32_45 dim 0 : vector<96x128xf32>, i32 -> vector<96x128xf32>
      %110 = vector.shape_cast %109 : vector<96x128xf32> to vector<4x24x128xf32>
      %111 = vector.extract_strided_slice %110 {offsets = [0, 0, 0], sizes = [4, 16, 128], strides = [1, 1, 1]} : vector<4x24x128xf32> to vector<4x16x128xf32>
      %c95_i32_46 = arith.constant 95 : i32
      %112 = tpu.dynamic_rotate %108 by %c95_i32_46 dim 0 : vector<96x128xf32>, i32 -> vector<96x128xf32>
      %113 = vector.shape_cast %112 : vector<96x128xf32> to vector<4x24x128xf32>
      %114 = vector.extract_strided_slice %113 {offsets = [0, 0, 0], sizes = [4, 16, 128], strides = [1, 1, 1]} : vector<4x24x128xf32> to vector<4x16x128xf32>
      %115 = vector.extract_strided_slice %107 {offsets = [0, 0, 0], sizes = [4, 16, 128], strides = [1, 1, 1]} : vector<4x24x128xf32> to vector<4x16x128xf32>
      %116 = vector.extract_strided_slice %34 {offsets = [6, 0], sizes = [1, 128], strides = [1, 1]} : vector<9x128xf32> to vector<1x128xf32>
      %117 = vector.shape_cast %116 : vector<1x128xf32> to vector<128xf32>
      %118 = vector.shape_cast %117 : vector<128xf32> to vector<1x1x128xf32>
      %119 = vector.broadcast %118 : vector<1x1x128xf32> to vector<4x16x128xf32>
      %120 = arith.mulf %111, %119 : vector<4x16x128xf32>
      %121 = arith.addf %104, %120 : vector<4x16x128xf32>
      %122 = vector.extract_strided_slice %34 {offsets = [7, 0], sizes = [1, 128], strides = [1, 1]} : vector<9x128xf32> to vector<1x128xf32>
      %123 = vector.shape_cast %122 : vector<1x128xf32> to vector<128xf32>
      %124 = vector.shape_cast %123 : vector<128xf32> to vector<1x1x128xf32>
      %125 = vector.broadcast %124 : vector<1x1x128xf32> to vector<4x16x128xf32>
      %126 = arith.mulf %115, %125 : vector<4x16x128xf32>
      %127 = arith.addf %121, %126 : vector<4x16x128xf32>
      %128 = vector.extract_strided_slice %34 {offsets = [8, 0], sizes = [1, 128], strides = [1, 1]} : vector<9x128xf32> to vector<1x128xf32>
      %129 = vector.shape_cast %128 : vector<1x128xf32> to vector<128xf32>
      %130 = vector.shape_cast %129 : vector<128xf32> to vector<1x1x128xf32>
      %131 = vector.broadcast %130 : vector<1x1x128xf32> to vector<4x16x128xf32>
      %132 = arith.mulf %114, %131 : vector<4x16x128xf32>
      %133 = arith.addf %127, %132 : vector<4x16x128xf32>
      %134 = vector.shape_cast %133 : vector<4x16x128xf32> to vector<64x128xf32>
      %135 = arith.truncf %134 : vector<64x128xf32> to vector<64x128xbf16>
      %cst_47 = arith.constant dense<0.000000e+00> : vector<64x32xf32>
      %136 = tpu.matmul %135, %37, %cst_47 {dimension_numbers = #tpu.dot_dimension_numbers<[1], [0], [0], [1], [0, 0, 1, 1], [], []>} : vector<64x128xbf16>, vector<128x32xbf16>, vector<64x32xf32> -> vector<64x32xf32>
      %137 = vector.shape_cast %39 : vector<32xf32> to vector<1x32xf32>
      %138 = vector.broadcast %137 : vector<1x32xf32> to vector<64x32xf32>
      %139 = arith.addf %136, %138 : vector<64x32xf32>
      %c16_i32 = arith.constant 16 : i32
      %140 = arith.muli %44, %c16_i32 : i32
      %141 = tpu.assume_multiple %140, 64 : i32
      %c0_48 = arith.constant 0 : index
      %142 = arith.index_cast %141 : i32 to index
      %c0_49 = arith.constant 0 : index
      %143 = vector.load %arg8[%c0_48, %142, %c0_49] : memref<1x256x32xf32, #tpu.memory_space<vmem>>, vector<1x64x32xf32>
      %144 = vector.shape_cast %143 : vector<1x64x32xf32> to vector<64x32xf32>
      %145 = vector.shape_cast %139 : vector<64x32xf32> to vector<1x64x32xf32>
      tpu.vector_store %arg8[%c0_48, %142, %c0_49], %145 {strides = array<i32>} : memref<1x256x32xf32, #tpu.memory_space<vmem>>, vector<1x64x32xf32>,
    }
    %c4_i32_30 = arith.constant 4 : i32
    return
  }
  func.func @transform_0(%arg0: i32) -> (i32, i32, i32) {
    %c0_i32 = arith.constant 0 : i32
    %c0_i32_0 = arith.constant 0 : i32
    %c0_i32_1 = arith.constant 0 : i32
    return %arg0, %c0_i32, %c0_i32_0 : i32, i32, i32
  }
  func.func @transform_1(%arg0: i32) -> (i32, i32) {
    %c0_i32 = arith.constant 0 : i32
    %c0_i32_0 = arith.constant 0 : i32
    %c0_i32_1 = arith.constant 0 : i32
    return %c0_i32, %c0_i32_0 : i32, i32
  }
  func.func @transform_2(%arg0: i32) -> (i32, i32) {
    %c0_i32 = arith.constant 0 : i32
    %c0_i32_0 = arith.constant 0 : i32
    %c0_i32_1 = arith.constant 0 : i32
    return %c0_i32, %c0_i32_0 : i32, i32
  }
  func.func @transform_3(%arg0: i32) -> (i32, i32) {
    %c0_i32 = arith.constant 0 : i32
    %c0_i32_0 = arith.constant 0 : i32
    %c0_i32_1 = arith.constant 0 : i32
    return %c0_i32, %c0_i32_0 : i32, i32
  }
  func.func @transform_4(%arg0: i32) -> (i32, i32) {
    %c0_i32 = arith.constant 0 : i32
    %c0_i32_0 = arith.constant 0 : i32
    %c0_i32_1 = arith.constant 0 : i32
    return %c0_i32, %c0_i32_0 : i32, i32
  }
  func.func @transform_5(%arg0: i32) -> (i32, i32) {
    %c0_i32 = arith.constant 0 : i32
    %c0_i32_0 = arith.constant 0 : i32
    %c0_i32_1 = arith.constant 0 : i32
    return %c0_i32, %c0_i32_0 : i32, i32
  }
  func.func @transform_6(%arg0: i32) -> (i32, i32) {
    %c0_i32 = arith.constant 0 : i32
    %c0_i32_0 = arith.constant 0 : i32
    %c0_i32_1 = arith.constant 0 : i32
    return %c0_i32, %c0_i32_0 : i32, i32
  }
  func.func @transform_7(%arg0: i32) -> (i32, i32, i32) {
    %c0_i32 = arith.constant 0 : i32
    %c0_i32_0 = arith.constant 0 : i32
    %c0_i32_1 = arith.constant 0 : i32
    return %arg0, %c0_i32, %c0_i32_0 : i32, i32, i32
  }
}

</mosaic_0001>

<bundles_post_ra>
// kernel: mlp_forward.1
= control target key start
LH: loop header
LB: loop body
LE: loop exit
PB: predicated region body
PF: predicated region fallthrough
CT: control target
= control target key end

     0   :  { %12 = vsyncpa [#allocation4], 0  ;;  %s2986_s0 = inlined_call_operand.vmem [shape: bf16[2,256,32], index: 0, kind: input, shape index: {}]   ;;  %s2987_s1 = inlined_call_operand.vmem [shape: bf16[32,128], index: 1, kind: input, shape index: {}]   ;;  %s2988_s2 = inlined_call_operand.vmem [shape: f32[1,128], index: 2, kind: input, shape index: {}]   ;;  %s2989_s3 = inlined_call_operand.vmem [shape: f32[9,128], index: 3, kind: input, shape index: {}]   ;;  %s2990_s4 = inlined_call_operand.vmem [shape: f32[1,128], index: 4, kind: input, shape index: {}]   ;;  %s2991_s5 = inlined_call_operand.vmem [shape: bf16[128,32], index: 5, kind: input, shape index: {}]   ;;  %s2992_s6 = inlined_call_operand.vmem [shape: f32[1,32], index: 6, kind: input, shape index: {}]   ;;  %s2993_s7 = inlined_call_operand.hbm [shape: f32[2,256,32], index: 7, kind: output, shape index: {}]  }
   0x1   :  { %14 = vsyncpa [#allocation4 + $0x1], 0  ;;  %s2024_s24 = smov 0   ;;  %s2026_s25 = smov 0  }
   0x2   :  { %s2028_s26 = smov 0   ;;  %s2030_s27 = smov 0  }
   0x3 LB: > { %s2045_s28 = sadd.s32 4294967295, %s1974_s27   ;;  %s1574_s29 = sadd.s32 4294967294, %s1974_s27   ;;  %s1974_s27 = sphi %s2030_s27, %s3036_s27   ;;  %s1970_s26 = sphi %s2028_s26, %s3035_s26   ;;  %s1966_s25 = sphi %s2026_s25, %s3034_s25   ;;  %s1962_s24 = sphi %s2024_s24, %s3033_s24  }
   0x4   : > { %s2049_s30 = sadd.s32 1, %s1974_s27   ;;  %s179_s8 = sadd.s32 1, %s1970_s26 }
   0x5   : > { %s176_s9 = ssub.s32 %s1974_s27, %s2049_s30  ;;  %p189_p0 = scmp.ne.s32.totalorder %s1970_s26, %s1966_s25 }
   0x6   : > { %p177_p1 = scmp.eq.s32.totalorder %s176_s9, 0  ;;  %p190_p2 = scmp.eq.s32.totalorder %s2045_s28, 1 }
   0x7   : > { %p195_p3 = scmp.ne.s32.totalorder %s1966_s25, %s1962_s24  ;;  %p196_p4 = scmp.eq.s32.totalorder %s1574_s29, 1 }
   0x8   : > { %s2060_s10 = scalar_select %p177_p1, %s1970_s26, %s179_s8  }
   0x9   : > { %p2062_p5 = por %p190_p2, %p189_p0  ;;  %p2066_p6 = por %p196_p4, %p195_p3 }
   0xa   : > { %p1577_p7 = scmp.ge.s32.totalorder %s1974_s27, 1  ;;  %p240_p8 = scmp.lt.s32.totalorder %s1974_s27, 3 }
   0xc   : > { %p241_p9 = pnand %p1577_p7, %p240_p8 }
   0xe   : > { %244 = sbr.rel (%p241_p9) target bundleno = 640 (0x280), region = 48 }
  0x15   : > { %s269_s13 = sand.u32 1, %s1966_s25   ;;  %v1826_v0 = vld [vmem:[%s2987_s1] sm:$0xff]   ;;  %v1827_v1 = vld [vmem:[%s2987_s1 + $0x8] sm:$0xff]   ;;  %p272_p10 = scmp.lt.s32.totalorder %s2045_s28, 1  ;;  %vm413_vm0 = vcmask 261120   ;;  %v1980_v18 = vmov 0.0  }
  0x16   : > { %s2078_s16 = sshll.u32 %s269_s13, 8  ;;  %1696 = vmatprep.subr.bf16.mxu0 %v1826_v0  ;;  %1756 = vmatprep.subr.bf16.mxu1 %v1826_v0  ;;  %911 = vst [vmem:[#allocation2] sm:$0xff] %v1980_v18  ;;  %912 = vst [vmem:[#allocation2 + $0x8] sm:$0xff] %v1980_v18  ;;  %v2125_v19 = vld [vmem:[%s2989_s3] sm:$0xff]  ;;  %v2130_v20 = vld [vmem:[%s2989_s3 + $0x8] ss:$0 sm:$0xff] }
  0x17   : > { %1697 = vmatpush3.bf16.msra.mxu0 %v1826_v0  ;;  %1758 = vmatpush3.bf16.msra.mxu1 %v1826_v0  ;;  %s273_s19 = scalar_select %p272_p10, %s2045_s28, 1  ;;  %913 = vst [vmem:[#allocation2 + $0x10] sm:$0xff] %v1980_v18  ;;  %915 = vst [vmem:[#allocation2 + $0x198] sm:$0xff] %v1980_v18  ;;  %v2135_v21 = vld [vmem:[%s2990_s4] ss:$0 sm:$0xff] }
  0x18   : > { %1698 = vmatprep.subr.bf16.mxu0 %v1827_v1  ;;  %1757 = vmatprep.subr.bf16.mxu1 %v1827_v1  ;;  %916 = vst [vmem:[#allocation2 + $0x1a0] sm:$0xff] %v1980_v18  ;;  %917 = vst [vmem:[#allocation2 + $0x1a8] sm:$0xff] %v1980_v18  ;;  %v2140_v22 = vld [vmem:[%s2991_s5] sm:$0xf]  ;;  %v2145_v23 = vld [vmem:[%s2991_s5 + $0x4] sm:$0xf] }
  0x19   : > { %s1663_s20 = sshll.u32 %s273_s19, 7  ;;  %919 = vst [vmem:[#allocation2 + $0x28] sm:$0xff] %v1980_v18  ;;  %920 = vst [vmem:[#allocation2 + $0x40] sm:$0xff] %v1980_v18  ;;  %v2150_v24 = vld [vmem:[%s2991_s5 + $0x8] sm:$0xf]  ;;  %s271_s18 = scalar_lea.vmem [#allocation3], %s2078_s16 }
  0x1a   : > { %s2088_s23 = scalar_lea.vmem %s2986_s0, %s1663_s20  ;;  %921 = vst [vmem:[#allocation2 + $0x58] sm:$0xff] %v1980_v18  ;;  %922 = vst [vmem:[#allocation2 + $0x70] sm:$0xff] %v1980_v18  ;;  %v2155_v25 = vld [vmem:[%s2991_s5 + $0xc] sm:$0xf]  ;;  %v2160_v26 = vld [vmem:[%s2991_s5 + $0x10] sm:$0xf] }
  0x1b   : > { %1699 = vmatpush3.bf16.msra.mxu0 %v1827_v1  ;;  %1759 = vmatpush3.bf16.msra.mxu1 %v1827_v1  ;;  %v1828_v2 = vld [vmem:[%s2088_s23] sm:$0xff]   ;;  %v1830_v4 = vld [vmem:[%s2088_s23 + $0x8] sm:$0xff]   ;;  %v1832_v6 = vld [vmem:[%s2088_s23 + $0x10] sm:$0xff]   ;;  %923 = vst [vmem:[#allocation2 + $0x88] sm:$0xff] %v1980_v18  ;;  %s2523_s19 = smov 0  }
  0x1c   : > { %v1829_v3 = vld [vmem:[%s2088_s23 + $0x40] sm:$0xff]   ;;  %1700 = vmatprep.mubr.msk.bf16.mxu0 %vm413_vm0, %v1828_v2  ;;  %v1831_v5 = vld [vmem:[%s2088_s23 + $0x48] sm:$0xff]   ;;  %v1833_v7 = vld [vmem:[%s2088_s23 + $0x50] sm:$0xff]   ;;  %924 = vst [vmem:[#allocation2 + $0xa0] sm:$0xff] %v1980_v18 }
  0x1d   : > { %1716 = vmatprep.mubr.msk.bf16.mxu1 %vm413_vm0, %v1829_v3  ;;  %v1834_v8 = vld [vmem:[%s2088_s23 + $0x18] sm:$0xff]   ;;  %v1836_v10 = vld [vmem:[%s2088_s23 + $0x20] sm:$0xff]   ;;  %v1838_v12 = vld [vmem:[%s2088_s23 + $0x28] sm:$0xff]   ;;  %925 = vst [vmem:[#allocation2 + $0xb8] sm:$0xff] %v1980_v18 }
  0x1e   : > { %1701 = vmatmul.mubr.msk.bf16.vlgmr.msra.gmra.mrb[0].mxu0 %vm413_vm0, %v1830_v4  ;;  %1717 = vmatmul.mubr.msk.bf16.vlgmr.msra.gmra.mrb[0].mxu1 %vm413_vm0, %v1831_v5  ;;  %v1835_v9 = vld [vmem:[%s2088_s23 + $0x58] sm:$0xff]   ;;  %v1837_v11 = vld [vmem:[%s2088_s23 + $0x60] sm:$0xff]   ;;  %v1839_v13 = vld [vmem:[%s2088_s23 + $0x68] sm:$0xff]   ;;  %926 = vst [vmem:[#allocation2 + $0xd0] sm:$0xff] %v1980_v18 }
  0x1f   : > { %1704 = vmatprep.mubr.msk.bf16.mxu0 %vm413_vm0, %v1832_v6  ;;  %1720 = vmatprep.mubr.msk.bf16.mxu1 %vm413_vm0, %v1833_v7  ;;  %v1840_v14 = vld [vmem:[%s2088_s23 + $0x30] sm:$0xff]   ;;  %v1842_v16 = vld [vmem:[%s2088_s23 + $0x38] sm:$0xff]   ;;  %927 = vst [vmem:[#allocation2 + $0xe8] sm:$0xff] %v1980_v18  ;;  %928 = vst [vmem:[#allocation2 + $0x100] sm:$0xff] %v1980_v18 }
  0x20   : > { %v1841_v15 = vld [vmem:[%s2088_s23 + $0x70] sm:$0xff]   ;;  %v1843_v17 = vld [vmem:[%s2088_s23 + $0x78] sm:$0xff]   ;;  %929 = vst [vmem:[#allocation2 + $0x118] sm:$0xff] %v1980_v18  ;;  %930 = vst [vmem:[#allocation2 + $0x130] sm:$0xff] %v1980_v18 }
  0x21   : > { %931 = vst [vmem:[#allocation2 + $0x148] sm:$0xff] %v1980_v18  ;;  %932 = vst [vmem:[#allocation2 + $0x160] sm:$0xff] %v1980_v18  ;;  %v2165_v27 = vld [vmem:[%s2991_s5 + $0x14] sm:$0xf]  ;;  %v2170_v28 = vld [vmem:[%s2991_s5 + $0x18] sm:$0xf] }
  0x22   : > { %933 = vst [vmem:[#allocation2 + $0x178] sm:$0xff] %v1980_v18  ;;  %934 = vst [vmem:[#allocation2 + $0x190] sm:$0xff] %v1980_v18  ;;  %v2175_v29 = vld [vmem:[%s2991_s5 + $0x1c] sm:$0xf]  ;;  %v2180_v30 = vld [vmem:[%s2991_s5 + $0x20] sm:$0xf] }
  0x23   : > { %3002 = vst [vmem:[#allocation6_spill] sm:$0xff] %v2125_v19  ;;  %3003 = vst [vmem:[#allocation7_spill] sm:$0xff] %v2130_v20  ;;  %v2185_v31 = vld [vmem:[%s2991_s5 + $0x24] sm:$0xf]  ;;  %v2190_v32 = vld [vmem:[%s2991_s5 + $0x28] sm:$0xf] }
  0x24   : > { %3004 = vst [vmem:[#allocation8_spill] sm:$0xff] %v2135_v21  ;;  %3005 = vst [vmem:[#allocation9_spill] sm:$0xff] %v2140_v22  ;;  %v2195_v33 = vld [vmem:[%s2991_s5 + $0x2c] sm:$0xf]  ;;  %v2200_v34 = vld [vmem:[%s2991_s5 + $0x30] sm:$0xf] }
  0x25   : > { %3006 = vst [vmem:[#allocation10_spill] sm:$0xff] %v2145_v23  ;;  %3007 = vst [vmem:[#allocation11_spill] sm:$0xff] %v2150_v24  ;;  %v2205_v35 = vld [vmem:[%s2991_s5 + $0x34] sm:$0xf]  ;;  %v2210_v36 = vld [vmem:[%s2991_s5 + $0x38] sm:$0xf] }
  0x26   : > { %1705 = vmatmul.mubr.msk.bf16.gmra.mrb[4].mxu0 %vm413_vm0, %v1834_v8  ;;  %1721 = vmatmul.mubr.msk.bf16.gmra.mrb[4].mxu1 %vm413_vm0, %v1835_v9  ;;  %3008 = vst [vmem:[#allocation12_spill] sm:$0xff] %v2155_v25  ;;  %3009 = vst [vmem:[#allocation13_spill] sm:$0xff] %v2160_v26  ;;  %v2215_v37 = vld [vmem:[%s2991_s5 + $0x3c] sm:$0xf]  ;;  %v2220_v38 = vld [vmem:[%s2992_s6] ss:$0 sm:$0xff] }
  0x27   : > { %1708 = vmatprep.mubr.msk.bf16.mxu0 %vm413_vm0, %v1836_v10  ;;  %1724 = vmatprep.mubr.msk.bf16.mxu1 %vm413_vm0, %v1837_v11  ;;  %3010 = vst [vmem:[#allocation14_spill] sm:$0xff] %v2165_v27  ;;  %3011 = vst [vmem:[#allocation15_spill] sm:$0xff] %v2170_v28  ;;  %v2225_v39 = vld [vmem:[%s2988_s2] ss:$0 sm:$0xff] }
  0x28   : > { %3012 = vst [vmem:[#allocation16_spill] sm:$0xff] %v2175_v29  ;;  %3013 = vst [vmem:[#allocation17_spill] sm:$0xff] %v2210_v36 }
  0x29   : > { %3014 = vst [vmem:[#allocation18_spill] sm:$0xff] %v2220_v38 }
  0x2e   : > { %1709 = vmatmul.mubr.msk.bf16.gmra.mrb[8].mxu0 %vm413_vm0, %v1838_v12  ;;  %1725 = vmatmul.mubr.msk.bf16.gmra.mrb[8].mxu1 %vm413_vm0, %v1839_v13 }
  0x2f   : > { %1712 = vmatprep.mubr.msk.bf16.mxu0 %vm413_vm0, %v1840_v14  ;;  %1728 = vmatprep.mubr.msk.bf16.mxu1 %vm413_vm0, %v1841_v15 }
  0x36   : > { %1713 = vmatmul.mubr.msk.bf16.gmra.mrb[12].mxu0 %vm413_vm0, %v1842_v16  ;;  %1729 = vmatmul.mubr.msk.bf16.gmra.mrb[12].mxu1 %vm413_vm0, %v1843_v17 }
  0xf1   : > { %v1702_v40 = vpop.f32.mrb[0].mxu0  ;;  %v1718_v42 = vpop.f32.mrb[0].mxu1 }
  0xf2   : > { %v505_v41 = vadd.f32 %v1702_v40, %v2225_v39  ;;  %v496_v43 = vpop.f32.mrb[1].mxu0  ;;  %v569_v44 = vadd.f32 %v1718_v42, %v2225_v39  ;;  %v560_v46 = vpop.f32.mrb[1].mxu1 }
  0xf3   : > { %v2230_v45 = vadd.f32 %v2225_v39, %v496_v43  ;;  %v1703_v47 = vpop.f32.mrb[2].mxu0  ;;  %v2233_v49 = vadd.f32 %v2225_v39, %v560_v46  ;;  %v1719_v51 = vpop.f32.mrb[2].mxu1 }
  0xf4   : > { %v657_v48 = vmul.f32 %v505_v41, %v505_v41  ;;  %v2236_v50 = vadd.f32 %v1703_v47, %v2225_v39  ;;  %v499_v52 = vpop.f32.mrb[3].mxu0  ;;  %v673_v53 = vmul.f32 %v569_v44, %v569_v44  ;;  %v563_v55 = vpop.f32.mrb[3].mxu1  ;;  %v2246_v61 = vadd.f32 %v1719_v51, %v2225_v39 }
  0xf5   : > { %v655_v54 = vmul.f32 %v2230_v45, %v2230_v45  ;;  %v671_v57 = vmul.f32 %v2233_v49, %v2233_v49  ;;  %v2250_v0 = vadd.f32 %v2225_v39, %v499_v52  ;;  %v2256_v8 = vadd.f32 %v2225_v39, %v563_v55 }
  0xf6   : > { %v689_v56 = vmul.f32 %v657_v48, %v505_v41  ;;  %v705_v58 = vmul.f32 %v673_v53, %v569_v44  ;;  %v658_v60 = vmul.f32 %v2236_v50, %v2236_v50  ;;  %v674_v7 = vmul.f32 %v2246_v61, %v2246_v61 }
  0xf7   : > { %v687_v59 = vmul.f32 %v655_v54, %v2230_v45  ;;  %v703_v63 = vmul.f32 %v671_v57, %v2233_v49  ;;  %v656_v14 = vmul.f32 %v2250_v0, %v2250_v0  ;;  %v2261_v17 = vmul.f32 0.5, %v505_v41 }
  0xf8   : > { %v721_v62 = vmul.f32 0.044715, %v689_v56  ;;  %v737_v1 = vmul.f32 0.044715, %v705_v58  ;;  %v690_v3 = vmul.f32 %v658_v60, %v2236_v50  ;;  %v706_v42 = vmul.f32 %v674_v7, %v2246_v61 }
  0xf9   : > { %v719_v2 = vmul.f32 0.044715, %v687_v59  ;;  %v1706_v4 = vpop.f32.mrb[4].mxu0  ;;  %v735_v6 = vmul.f32 0.044715, %v703_v63  ;;  %v1722_v9 = vpop.f32.mrb[4].mxu1  ;;  %v688_v52 = vmul.f32 %v656_v14, %v2250_v0  ;;  %v672_v55 = vmul.f32 %v2256_v8, %v2256_v8 }
  0xfa   : > { %v753_v5 = vadd.f32 %v721_v62, %v505_v41  ;;  %v512_v10 = vpop.f32.mrb[5].mxu0  ;;  %v769_v11 = vadd.f32 %v737_v1, %v569_v44  ;;  %v722_v13 = vmul.f32 0.044715, %v690_v3  ;;  %v576_v15 = vpop.f32.mrb[5].mxu1  ;;  %v738_v54 = vmul.f32 0.044715, %v706_v42 }
  0xfb   : > { %v751_v12 = vadd.f32 %v719_v2, %v2230_v45  ;;  %v1707_v16 = vpop.f32.mrb[6].mxu0  ;;  %v767_v40 = vadd.f32 %v735_v6, %v2233_v49  ;;  %v2265_v43 = vpop.f32.mrb[6].mxu1  ;;  %v720_v57 = vmul.f32 0.044715, %v688_v52  ;;  %v2276_v58 = vadd.f32 %v1706_v4, %v2225_v39 }
  0xfc   : > { %v785_v18 = vmul.f32 0.7978846, %v753_v5  ;;  %v2267_v46 = vpop.f32.mrb[7].mxu0  ;;  %v801_v47 = vmul.f32 0.7978846, %v769_v11  ;;  %v754_v51 = vadd.f32 %v722_v13, %v2236_v50  ;;  %v2271_v53 = vpop.f32.mrb[7].mxu1  ;;  %v770_v59 = vadd.f32 %v738_v54, %v2246_v61 }
  0xfd   : > { %v783_v48 = vmul.f32 0.7978846, %v751_v12  ;;  %v799_v41 = vmul.f32 0.7978846, %v767_v40  ;;  %v704_v60 = vmul.f32 %v672_v55, %v2256_v8  ;;  %v2281_v62 = vadd.f32 %v1722_v9, %v2225_v39 }
  0xfe   : > { %1844 = vtanh.f32 %v785_v18  ;;  %v786_v56 = vmul.f32 0.7978846, %v754_v51  ;;  %v641_v63 = vmul.f32 0.5, %v569_v44  ;;  %v752_v1 = vadd.f32 %v720_v57, %v2250_v0 }
  0xff   : > { %1846 = vtanh.f32 %v801_v47  ;;  %v661_v2 = vmul.f32 %v2276_v58, %v2276_v58  ;;  %v623_v4 = vmul.f32 0.5, %v2230_v45  ;;  %v802_v5 = vmul.f32 0.7978846, %v770_v59 }
 0x100   : > { %1848 = vtanh.f32 %v783_v48  ;;  %v736_v6 = vmul.f32 0.044715, %v704_v60  ;;  %v784_v11 = vmul.f32 0.7978846, %v752_v1  ;;  %v677_v44 = vmul.f32 %v2281_v62, %v2281_v62 }
 0x101   : > { %1850 = vtanh.f32 %v799_v41  ;;  %v2286_v3 = vpop.f32.mrb[8].mxu0  ;;  %v2289_v7 = vpop.f32.mrb[8].mxu1  ;;  %v693_v9 = vmul.f32 %v661_v2, %v2276_v58  ;;  %v2295_v12 = vadd.f32 %v2225_v39, %v512_v10  ;;  %v2303_v18 = vadd.f32 %v2225_v39, %v576_v15 }
 0x102   : > { %1852 = vtanh.f32 %v786_v56  ;;  %v2297_v13 = vpop.f32.mrb[9].mxu0  ;;  %v2299_v14 = vpop.f32.mrb[9].mxu1  ;;  %v768_v45 = vadd.f32 %v736_v6, %v2256_v8  ;;  %v2306_v40 = vadd.f32 %v1707_v16, %v2225_v39  ;;  %v639_v10 = vmul.f32 0.5, %v2233_v49 }
 0x103   : > { %1854 = vtanh.f32 %v802_v5  ;;  %v2308_v42 = vpop.f32.mrb[10].mxu0  ;;  %v2310_v47 = vpop.f32.mrb[10].mxu1  ;;  %v725_v48 = vmul.f32 0.044715, %v693_v9  ;;  %v709_v51 = vmul.f32 %v677_v44, %v2281_v62  ;;  %v626_v15 = vmul.f32 0.5, %v2236_v50 }
 0x104   : > { %1856 = vtanh.f32 %v784_v11  ;;  %v2314_v52 = vpop.f32.mrb[11].mxu0  ;;  %v2316_v41 = vpop.f32.mrb[11].mxu1  ;;  %v800_v54 = vmul.f32 0.7978846, %v768_v45  ;;  %v659_v16 = vmul.f32 %v2295_v12, %v2295_v12  ;;  %v675_v55 = vmul.f32 %v2303_v18, %v2303_v18 }
 0x105   : > { %v642_v56 = vmul.f32 0.5, %v2246_v61  ;;  %v757_v49 = vadd.f32 %v725_v48, %v2276_v58  ;;  %v741_v57 = vmul.f32 0.044715, %v709_v51  ;;  %v662_v59 = vmul.f32 %v2306_v40, %v2306_v40 }
 0x106   : > { %v624_v1 = vmul.f32 0.5, %v2250_v0  ;;  %1858 = vtanh.f32 %v800_v54  ;;  %v691_v50 = vmul.f32 %v659_v16, %v2295_v12  ;;  %v707_v2 = vmul.f32 %v675_v55, %v2303_v18 }
 0x107   : > { %v789_v11 = vmul.f32 0.7978846, %v757_v49  ;;  %v773_v9 = vadd.f32 %v741_v57, %v2281_v62  ;;  %v694_v61 = vmul.f32 %v662_v59, %v2306_v40  ;;  %v2336_v0 = vadd.f32 %v2265_v43, %v2225_v39 }
 0x108   : > { %v1845_v60 = vpop.eup %1844  ;;  %v723_v51 = vmul.f32 0.044715, %v691_v50  ;;  %v739_v38 = vmul.f32 0.044715, %v707_v2 }
 0x109   : > { %v1847_v5 = vpop.eup %1846  ;;  %v849_v6 = vadd.f32 1.0, %v1845_v60  ;;  %v2332_v44 = vpop.f32.mrb[12].mxu0  ;;  %1860 = vtanh.f32 %v789_v11  ;;  %v805_v49 = vmul.f32 0.7978846, %v773_v9  ;;  %v726_v11 = vmul.f32 0.044715, %v694_v61 }
 0x10a   : > { %v1849_v45 = vpop.eup %1848  ;;  %v865_v48 = vadd.f32 1.0, %v1847_v5  ;;  %v2339_v60 = vpop.f32.mrb[12].mxu1  ;;  %v755_v50 = vadd.f32 %v723_v51, %v2295_v12  ;;  %v771_v2 = vadd.f32 %v739_v38, %v2303_v18  ;;  %v678_v38 = vmul.f32 %v2336_v0, %v2336_v0 }
 0x10b   : > { %v1851_v54 = vpop.eup %1850  ;;  %v881_v16 = vmul.f32 %v849_v6, %v2261_v17  ;;  %v847_v55 = vadd.f32 1.0, %v1849_v45  ;;  %v2341_v57 = vpop.f32.mrb[13].mxu0  ;;  %1862 = vtanh.f32 %v805_v49  ;;  %v758_v61 = vadd.f32 %v726_v11, %v2306_v40 }
 0x10c   : > { %v1853_v59 = vpop.eup %1852  ;;  %v897_v20 = vmul.f32 %v865_v48, %v641_v63  ;;  %v863_v21 = vadd.f32 1.0, %v1851_v54  ;;  %v2345_v5 = vpop.f32.mrb[13].mxu1  ;;  %v787_v48 = vmul.f32 0.7978846, %v755_v50  ;;  %v803_v51 = vmul.f32 0.7978846, %v771_v2 }
 0x10d   : > { %v2347_v43 = vpop.f32.mrb[14].mxu0  ;;  %937 = vst [vmem:[#allocation2 + $0x30] sm:$0xff] %v881_v16  ;;  %v879_v17 = vmul.f32 %v847_v55, %v623_v4  ;;  %v850_v6 = vadd.f32 1.0, %v1853_v59  ;;  %v2349_v9 = vpop.f32.mrb[14].mxu1  ;;  %v2360_v55 = vadd.f32 %v2225_v39, %v2267_v46  ;;  %v629_v46 = vmul.f32 0.5, %v2276_v58 }
 0x10e   : > { %v2351_v45 = vpop.f32.mrb[15].mxu0  ;;  %v1855_v19 = vpop.eup %1854  ;;  %953 = vst [vmem:[#allocation2 + $0xf0] sm:$0xff] %v897_v20  ;;  %v895_v63 = vmul.f32 %v863_v21, %v639_v10  ;;  %1864 = vtanh.f32 %v787_v48  ;;  %v710_v21 = vmul.f32 %v678_v38, %v2336_v0  ;;  %v2365_v10 = vadd.f32 %v2225_v39, %v2271_v53 }
 0x10f   : > { %v2355_v54 = vpop.f32.mrb[15].mxu1  ;;  %v1857_v36 = vpop.eup %1856  ;;  %935 = vst [vmem:[#allocation2 + $0x18] sm:$0xff] %v879_v17  ;;  %v882_v4 = vmul.f32 %v850_v6, %v626_v15  ;;  %v866_v16 = vadd.f32 1.0, %v1855_v19  ;;  %v640_v15 = vmul.f32 0.5, %v2256_v8  ;;  %1866 = vtanh.f32 %v803_v51 }
 0x110   : > { %951 = vst [vmem:[#allocation2 + $0xd8] sm:$0xff] %v895_v63  ;;  %v848_v20 = vadd.f32 1.0, %v1857_v36  ;;  %v790_v19 = vmul.f32 0.7978846, %v758_v61  ;;  %v1859_v59 = vpop.eup %1858  ;;  %v742_v2 = vmul.f32 0.044715, %v710_v21  ;;  %v660_v36 = vmul.f32 %v2360_v55, %v2360_v55 }
 0x111   : > { %938 = vst [vmem:[#allocation2 + $0x38] sm:$0xff] %v882_v4  ;;  %v898_v49 = vmul.f32 %v866_v16, %v642_v56  ;;  %v864_v17 = vadd.f32 1.0, %v1859_v59  ;;  %v676_v53 = vmul.f32 %v2365_v10, %v2365_v10  ;;  %v2375_v56 = vadd.f32 %v2286_v3, %v2225_v39 }
 0x112   : > { %v880_v50 = vmul.f32 %v848_v20, %v624_v1  ;;  %1868 = vtanh.f32 %v790_v19  ;;  %v645_v8 = vmul.f32 0.5, %v2281_v62  ;;  %v774_v1 = vadd.f32 %v742_v2, %v2336_v0 }
 0x113   : > { %954 = vst [vmem:[#allocation2 + $0xf8] sm:$0xff] %v898_v49  ;;  %v692_v58 = vmul.f32 %v660_v36, %v2360_v55  ;;  %v2382_v6 = vadd.f32 %v2289_v7, %v2225_v39  ;;  %v1861_v11 = vpop.eup %1860  ;;  %v896_v63 = vmul.f32 %v864_v17, %v640_v15  ;;  %v708_v48 = vmul.f32 %v676_v53, %v2365_v10 }
 0x114   : > { %936 = vst [vmem:[#allocation2 + $0x20] sm:$0xff] %v880_v50  ;;  %v665_v51 = vmul.f32 %v2375_v56, %v2375_v56  ;;  %v2389_v3 = vadd.f32 %v2225_v39, %v2297_v13  ;;  %v853_v62 = vadd.f32 1.0, %v1861_v11  ;;  %v627_v38 = vmul.f32 0.5, %v2295_v12 }
 0x115   : > { %v806_v4 = vmul.f32 0.7978846, %v774_v1  ;;  %v724_v16 = vmul.f32 0.044715, %v692_v58  ;;  %v1863_v61 = vpop.eup %1862  ;;  %952 = vst [vmem:[#allocation2 + $0xe0] sm:$0xff] %v896_v63  ;;  %v643_v7 = vmul.f32 0.5, %v2303_v18  ;;  %v681_v49 = vmul.f32 %v2382_v6, %v2382_v6 }
 0x116   : > { %v740_v20 = vmul.f32 0.044715, %v708_v48  ;;  %v697_v21 = vmul.f32 %v665_v51, %v2375_v56  ;;  %v885_v15 = vmul.f32 %v853_v62, %v629_v46  ;;  %v869_v19 = vadd.f32 1.0, %v1863_v61 }
 0x117   : > { %1870 = vtanh.f32 %v806_v4  ;;  %v756_v13 = vadd.f32 %v724_v16, %v2360_v55  ;;  %v713_v50 = vmul.f32 %v681_v49, %v2382_v6  ;;  %v663_v2 = vmul.f32 %v2389_v3, %v2389_v3 }
 0x118   : > { %v772_v59 = vadd.f32 %v740_v20, %v2365_v10  ;;  %v729_v12 = vmul.f32 0.044715, %v697_v21  ;;  %v1865_v18 = vpop.eup %1864  ;;  %941 = vst [vmem:[#allocation2 + $0x60] sm:$0xff] %v885_v15  ;;  %v901_v36 = vmul.f32 %v869_v19, %v645_v8  ;;  %v2403_v53 = vadd.f32 %v2225_v39, %v2299_v14 }
 0x119   : > { %v788_v17 = vmul.f32 0.7978846, %v756_v13  ;;  %v2407_v46 = vadd.f32 %v2308_v42, %v2225_v39  ;;  %v1867_v1 = vpop.eup %1866  ;;  %v851_v58 = vadd.f32 1.0, %v1865_v18  ;;  %v745_v48 = vmul.f32 0.044715, %v713_v50 }
 0x11a   : > { %v804_v11 = vmul.f32 0.7978846, %v772_v59  ;;  %v761_v63 = vadd.f32 %v729_v12, %v2375_v56  ;;  %957 = vst [vmem:[#allocation2 + $0x120] sm:$0xff] %v901_v36  ;;  %v867_v51 = vadd.f32 1.0, %v1867_v1  ;;  %v630_v62 = vmul.f32 0.5, %v2306_v40 }
 0x11b   : > { %1872 = vtanh.f32 %v788_v17  ;;  %v695_v8 = vmul.f32 %v663_v2, %v2389_v3  ;;  %v883_v14 = vmul.f32 %v851_v58, %v627_v38  ;;  %v777_v42 = vadd.f32 %v745_v48, %v2382_v6 }
 0x11c   : > { %v1869_v4 = vpop.eup %1868  ;;  %1874 = vtanh.f32 %v804_v11  ;;  %v793_v16 = vmul.f32 0.7978846, %v761_v63  ;;  %v899_v61 = vmul.f32 %v867_v51, %v643_v7  ;;  %v679_v49 = vmul.f32 %v2403_v53, %v2403_v53 }
 0x11d   : > { %v854_v20 = vadd.f32 1.0, %v1869_v4  ;;  %v727_v21 = vmul.f32 0.044715, %v695_v8  ;;  %939 = vst [vmem:[#allocation2 + $0x48] sm:$0xff] %v883_v14  ;;  %v646_v15 = vmul.f32 0.5, %v2336_v0  ;;  %v666_v19 = vmul.f32 %v2407_v46, %v2407_v46 }
 0x11e   : > { %1876 = vtanh.f32 %v793_v16  ;;  %v809_v40 = vmul.f32 0.7978846, %v777_v42  ;;  %955 = vst [vmem:[#allocation2 + $0x108] sm:$0xff] %v899_v61  ;;  %v711_v59 = vmul.f32 %v679_v49, %v2403_v53  ;;  %v2422_v7 = vadd.f32 %v2310_v47, %v2225_v39 }
 0x11f   : > { %v886_v38 = vmul.f32 %v854_v20, %v630_v62  ;;  %v759_v13 = vadd.f32 %v727_v21, %v2389_v3  ;;  %v698_v12 = vmul.f32 %v666_v19, %v2407_v46  ;;  %v2427_v0 = vadd.f32 %v2225_v39, %v2314_v52 }
 0x120   : > { %1878 = vtanh.f32 %v809_v40  ;;  %v2431_v50 = vadd.f32 %v2225_v39, %v2316_v41  ;;  %v628_v18 = vmul.f32 0.5, %v2360_v55  ;;  %v743_v17 = vmul.f32 0.044715, %v711_v59 }
 0x121   : > { %v1871_v2 = vpop.eup %1870  ;;  %942 = vst [vmem:[#allocation2 + $0x68] sm:$0xff] %v886_v38  ;;  %v791_v36 = vmul.f32 0.7978846, %v759_v13  ;;  %v682_v47 = vmul.f32 %v2422_v7, %v2422_v7  ;;  %v644_v58 = vmul.f32 0.5, %v2365_v10  ;;  %v730_v11 = vmul.f32 0.044715, %v698_v12 }
 0x122   : > { %v870_v1 = vadd.f32 1.0, %v1871_v2  ;;  %v664_v52 = vmul.f32 %v2427_v0, %v2427_v0  ;;  %v633_v63 = vmul.f32 0.5, %v2375_v56  ;;  %v775_v41 = vadd.f32 %v743_v17, %v2403_v53 }
 0x123   : > { %1880 = vtanh.f32 %v791_v36  ;;  %v714_v48 = vmul.f32 %v682_v47, %v2422_v7  ;;  %v762_v51 = vadd.f32 %v730_v11, %v2407_v46  ;;  %v680_v8 = vmul.f32 %v2431_v50, %v2431_v50 }
 0x124   : > { %v902_v55 = vmul.f32 %v870_v1, %v646_v15  ;;  %v696_v62 = vmul.f32 %v664_v52, %v2427_v0  ;;  %v807_v4 = vmul.f32 0.7978846, %v775_v41  ;;  %v2448_v16 = vadd.f32 %v2332_v44, %v2225_v39 }
 0x125   : > { %v1873_v10 = vpop.eup %1872  ;;  %v746_v14 = vmul.f32 0.044715, %v714_v48  ;;  %v2452_v56 = vadd.f32 %v2339_v60, %v2225_v39  ;;  %v794_v20 = vmul.f32 0.7978846, %v762_v51  ;;  %v712_v49 = vmul.f32 %v680_v8, %v2431_v50 }
 0x126   : > { %v1875_v42 = vpop.eup %1874  ;;  %958 = vst [vmem:[#allocation2 + $0x128] sm:$0xff] %v902_v55  ;;  %v852_v61 = vadd.f32 1.0, %v1873_v10  ;;  %v728_v21 = vmul.f32 0.044715, %v696_v62  ;;  %v649_v40 = vmul.f32 0.5, %v2382_v6  ;;  %1882 = vtanh.f32 %v807_v4 }
 0x127   : > { %v868_v15 = vadd.f32 1.0, %v1875_v42  ;;  %v778_v19 = vadd.f32 %v746_v14, %v2422_v7  ;;  %1884 = vtanh.f32 %v794_v20  ;;  %v744_v60 = vmul.f32 0.044715, %v712_v49 }
 0x128   : > { %v1877_v38 = vpop.eup %1876  ;;  %v884_v44 = vmul.f32 %v852_v61, %v628_v18  ;;  %v760_v13 = vadd.f32 %v728_v21, %v2427_v0  ;;  %v669_v36 = vmul.f32 %v2448_v16, %v2448_v16  ;;  %v631_v47 = vmul.f32 0.5, %v2389_v3 }
 0x129   : > { %v900_v59 = vmul.f32 %v868_v15, %v644_v58  ;;  %v857_v12 = vadd.f32 1.0, %v1877_v38  ;;  %v810_v2 = vmul.f32 0.7978846, %v778_v19  ;;  %v776_v1 = vadd.f32 %v744_v60, %v2431_v50 }
 0x12a   : > { %v1879_v17 = vpop.eup %1878  ;;  %940 = vst [vmem:[#allocation2 + $0x50] sm:$0xff] %v884_v44  ;;  %v792_v6 = vmul.f32 0.7978846, %v760_v13  ;;  %v685_v18 = vmul.f32 %v2452_v56, %v2452_v56  ;;  %v701_v58 = vmul.f32 %v669_v36, %v2448_v16  ;;  %v2468_v55 = vadd.f32 %v2225_v39, %v2341_v57 }
 0x12b   : > { %956 = vst [vmem:[#allocation2 + $0x110] sm:$0xff] %v900_v59  ;;  %v889_v11 = vmul.f32 %v857_v12, %v633_v63  ;;  %v873_v52 = vadd.f32 1.0, %v1879_v17  ;;  %1886 = vtanh.f32 %v810_v2  ;;  %v808_v41 = vmul.f32 0.7978846, %v776_v1 }
 0x12c   : > { %1888 = vtanh.f32 %v792_v6  ;;  %v717_v48 = vmul.f32 %v685_v18, %v2452_v56  ;;  %v733_v62 = vmul.f32 0.044715, %v701_v58  ;;  %v2472_v8 = vadd.f32 %v2225_v39, %v2345_v5 }
 0x12d   : > { %v1881_v3 = vpop.eup %1880  ;;  %945 = vst [vmem:[#allocation2 + $0x90] sm:$0xff] %v889_v11  ;;  %v905_v51 = vmul.f32 %v873_v52, %v649_v40  ;;  %v2476_v63 = vadd.f32 %v2347_v43, %v2225_v39  ;;  %v647_v4 = vmul.f32 0.5, %v2403_v53  ;;  %1890 = vtanh.f32 %v808_v41 }
 0x12e   : > { %v855_v10 = vadd.f32 1.0, %v1881_v3  ;;  %v749_v14 = vmul.f32 0.044715, %v717_v48  ;;  %v634_v57 = vmul.f32 0.5, %v2407_v46  ;;  %v765_v42 = vadd.f32 %v733_v62, %v2448_v16 }
 0x12f   : > { %961 = vst [vmem:[#allocation2 + $0x150] sm:$0xff] %v905_v51  ;;  %v667_v61 = vmul.f32 %v2468_v55, %v2468_v55  ;;  %v683_v5 = vmul.f32 %v2472_v8, %v2472_v8  ;;  %v650_v43 = vmul.f32 0.5, %v2422_v7  ;;  %v670_v53 = vmul.f32 %v2476_v63, %v2476_v63 }
 0x130   : > { %v887_v20 = vmul.f32 %v855_v10, %v631_v47  ;;  %v781_v21 = vadd.f32 %v749_v14, %v2452_v56  ;;  %v1883_v49 = vpop.eup %1882  ;;  %v797_v15 = vmul.f32 0.7978846, %v765_v42  ;;  %v2493_v19 = vadd.f32 %v2349_v9, %v2225_v39 }
 0x131   : > { %v699_v46 = vmul.f32 %v667_v61, %v2468_v55  ;;  %v715_v40 = vmul.f32 %v683_v5, %v2472_v8  ;;  %v1885_v38 = vpop.eup %1884  ;;  %v871_v44 = vadd.f32 1.0, %v1883_v49  ;;  %v702_v7 = vmul.f32 %v670_v53, %v2476_v63 }
 0x132   : > { %943 = vst [vmem:[#allocation2 + $0x78] sm:$0xff] %v887_v20  ;;  %v813_v13 = vmul.f32 0.7978846, %v781_v21  ;;  %v2498_v60 = vadd.f32 %v2225_v39, %v2351_v45  ;;  %v858_v59 = vadd.f32 1.0, %v1885_v38  ;;  %1892 = vtanh.f32 %v797_v15 }
 0x133   : > { %v731_v12 = vmul.f32 0.044715, %v699_v46  ;;  %v747_v2 = vmul.f32 0.044715, %v715_v40  ;;  %v903_v36 = vmul.f32 %v871_v44, %v647_v4  ;;  %v632_v17 = vmul.f32 0.5, %v2427_v0 }
 0x134   : > { %1894 = vtanh.f32 %v813_v13  ;;  %v734_v9 = vmul.f32 0.044715, %v702_v7  ;;  %v890_v6 = vmul.f32 %v858_v59, %v634_v57  ;;  %v686_v11 = vmul.f32 %v2493_v19, %v2493_v19 }
 0x135   : > { %v1887_v47 = vpop.eup %1886  ;;  %v763_v1 = vadd.f32 %v731_v12, %v2468_v55  ;;  %v779_v18 = vadd.f32 %v747_v2, %v2472_v8  ;;  %959 = vst [vmem:[#allocation2 + $0x138] sm:$0xff] %v903_v36  ;;  %v648_v58 = vmul.f32 0.5, %v2431_v50  ;;  %v668_v0 = vmul.f32 %v2498_v60, %v2498_v60 }
 0x136   : > { %v1889_v45 = vpop.eup %1888  ;;  %v874_v52 = vadd.f32 1.0, %v1887_v47  ;;  %v766_v41 = vadd.f32 %v734_v9, %v2476_v63  ;;  %946 = vst [vmem:[#allocation2 + $0x98] sm:$0xff] %v890_v6  ;;  %v718_v62 = vmul.f32 %v686_v11, %v2493_v19  ;;  %v612_v42 = vadd.f32 %v2225_v39, %v2355_v54 }
 0x137   : > { %v856_v48 = vadd.f32 1.0, %v1889_v45  ;;  %v795_v3 = vmul.f32 0.7978846, %v763_v1  ;;  %v811_v51 = vmul.f32 0.7978846, %v779_v18  ;;  %v1891_v10 = vpop.eup %1890  ;;  %v700_v57 = vmul.f32 %v668_v0, %v2498_v60 }
 0x138   : > { %v906_v4 = vmul.f32 %v874_v52, %v650_v43  ;;  %v798_v14 = vmul.f32 0.7978846, %v766_v41  ;;  %v872_v61 = vadd.f32 1.0, %v1891_v10  ;;  %v750_v5 = vmul.f32 0.044715, %v718_v62 }
 0x139   : > { %v888_v50 = vmul.f32 %v856_v48, %v632_v17  ;;  %1896 = vtanh.f32 %v795_v3  ;;  %v732_v20 = vmul.f32 0.044715, %v700_v57  ;;  %v684_v21 = vmul.f32 %v612_v42, %v612_v42 }
 0x13a   : > { %962 = vst [vmem:[#allocation2 + $0x158] sm:$0xff] %v906_v4  ;;  %1898 = vtanh.f32 %v811_v51  ;;  %v904_v53 = vmul.f32 %v872_v61, %v648_v58  ;;  %v782_v49 = vadd.f32 %v750_v5, %v2493_v19  ;;  %v637_v54 = vmul.f32 0.5, %v2448_v16 }
 0x13b   : > { %944 = vst [vmem:[#allocation2 + $0x80] sm:$0xff] %v888_v50  ;;  %1900 = vtanh.f32 %v798_v14  ;;  %v764_v43 = vadd.f32 %v732_v20, %v2498_v60  ;;  %v716_v15 = vmul.f32 %v684_v21, %v612_v42  ;;  %v653_v7 = vmul.f32 0.5, %v2452_v56 }
 0x13c   : > { %v1893_v46 = vpop.eup %1892  ;;  %960 = vst [vmem:[#allocation2 + $0x140] sm:$0xff] %v904_v53  ;;  %v814_v40 = vmul.f32 0.7978846, %v782_v49  ;;  %v635_v6 = vmul.f32 0.5, %v2468_v55  ;;  %v651_v18 = vmul.f32 0.5, %v2472_v8  ;;  %v638_v45 = vmul.f32 0.5, %v2476_v63 }
 0x13d   : > { %v861_v38 = vadd.f32 1.0, %v1893_v46  ;;  %v796_v44 = vmul.f32 0.7978846, %v764_v43  ;;  %v748_v13 = vmul.f32 0.044715, %v716_v15  ;;  %v654_v55 = vmul.f32 0.5, %v2493_v19 }
 0x13e   : > { %v1895_v39 = vpop.eup %1894  ;;  %1902 = vtanh.f32 %v814_v40  ;;  %v636_v51 = vmul.f32 0.5, %v2498_v60  ;;  %v652_v63 = vmul.f32 0.5, %v612_v42 }
 0x13f   : > { %v877_v59 = vadd.f32 1.0, %v1895_v39  ;;  %v893_v12 = vmul.f32 %v861_v38, %v637_v54  ;;  %1904 = vtanh.f32 %v796_v44  ;;  %v780_v2 = vadd.f32 %v748_v13, %v612_v42 }
 0x141   : > { %v909_v36 = vmul.f32 %v877_v59, %v653_v7  ;;  %949 = vst [vmem:[#allocation2 + $0xc0] sm:$0xff] %v893_v12  ;;  %v812_v17 = vmul.f32 0.7978846, %v780_v2 }
 0x143   : > { %v1897_v9 = vpop.eup %1896  ;;  %965 = vst [vmem:[#allocation2 + $0x180] sm:$0xff] %v909_v36  ;;  %1906 = vtanh.f32 %v812_v17 }
 0x144   : > { %v1899_v47 = vpop.eup %1898  ;;  %v859_v1 = vadd.f32 1.0, %v1897_v9 }
 0x145   : > { %v1901_v16 = vpop.eup %1900  ;;  %v875_v11 = vadd.f32 1.0, %v1899_v47 }
 0x146   : > { %v891_v56 = vmul.f32 %v859_v1, %v635_v6  ;;  %v862_v52 = vadd.f32 1.0, %v1901_v16 }
 0x147   : > { %v907_v58 = vmul.f32 %v875_v11, %v651_v18 }
 0x148   : > { %947 = vst [vmem:[#allocation2 + $0xa8] sm:$0xff] %v891_v56  ;;  %v894_v41 = vmul.f32 %v862_v52, %v638_v45  ;;  %v1903_v0 = vpop.eup %1902 }
 0x149   : > { %963 = vst [vmem:[#allocation2 + $0x168] sm:$0xff] %v907_v58  ;;  %v1905_v48 = vpop.eup %1904  ;;  %v878_v3 = vadd.f32 1.0, %v1903_v0 }
 0x14a   : > { %950 = vst [vmem:[#allocation2 + $0xc8] sm:$0xff] %v894_v41  ;;  %v860_v62 = vadd.f32 1.0, %v1905_v48 }
 0x14b   : > { %v910_v8 = vmul.f32 %v878_v3, %v654_v55 }
 0x14c   : > { %v892_v10 = vmul.f32 %v860_v62, %v636_v51 }
 0x14d   : > { %v1907_v4 = vpop.eup %1906  ;;  %966 = vst [vmem:[#allocation2 + $0x188] sm:$0xff] %v910_v8 }
 0x14e   : > { %948 = vst [vmem:[#allocation2 + $0xb0] sm:$0xff] %v892_v10  ;;  %v876_v14 = vadd.f32 1.0, %v1907_v4 }
 0x150   : > { %v908_v57 = vmul.f32 %v876_v14, %v652_v63 }
 0x152   : > { %964 = vst [vmem:[#allocation2 + $0x170] sm:$0xff] %v908_v57 }
 0x153 LB: >> { %v3015_v23 = vld [vmem:[#allocation10_spill] sm:$0xff]  ;;  %v3016_v22 = vld [vmem:[#allocation9_spill] sm:$0xff]  ;;  %v3017_v25 = vld [vmem:[#allocation12_spill] sm:$0xff]  ;;  %s1618_s20 = smul.u32 96, %s1978_s19  ;;  %v1026_v42 = vlaneseq  ;;  %v2541_v20 = vcombine.low %v2180_v30, %v2185_v31  ;;  %v2545_v21 = vcombine.low %v2190_v32, %v2195_v33  ;;  %v2549_v53 = vcombine.low %v2200_v34, %v2205_v35  ;;  %s1664_s22 = sshll.u32 %s1978_s19, 6  ;;  %s1978_s19 = sphi %s2523_s19, %s992_s19  }
 0x154   : >> { %v1649_v19 = vcombine.low %v3016_v22, %v3015_v23  ;;  %v3018_v24 = vld [vmem:[#allocation11_spill] sm:$0xff]  ;;  %v3019_v27 = vld [vmem:[#allocation14_spill] sm:$0xff]  ;;  %v3020_v26 = vld [vmem:[#allocation13_spill] sm:$0xff]  ;;  %s1472_s23 = scalar_lea.vmem %s271_s18, %s1664_s22 [#allocation3]  ;;  %s992_s19 = sadd.s32 1, %s1978_s19  }
 0x155   : >> { %v1650_v60 = vcombine.low %v3018_v24, %v3017_v25  ;;  %v1651_v50 = vcombine.low %v3020_v26, %v3019_v27  ;;  %v3021_v29 = vld [vmem:[#allocation16_spill] sm:$0xff]  ;;  %v3022_v28 = vld [vmem:[#allocation15_spill] sm:$0xff]  ;;  %v2537_v5 = vshrl.u32 %v1026_v42, 7  ;;  %v3023_v49 = vld [vmem:[#allocation17_spill] sm:$0xff]  ;;  %s2555_s21 = scalar_lea.vmem [#allocation2], %s1618_s20  ;;  %p989_p11 = scmp.ge.s32.totalorder %s992_s19, 4  }
 0x156   : >> { %1732 = vmatprep.subr.bf16.mxu0 %v1649_v19  ;;  %1760 = vmatprep.subr.bf16.mxu1 %v1649_v19  ;;  %v1652_v61 = vcombine.low %v3022_v28, %v3021_v29  ;;  %v2553_v43 = vcombine.low %v3023_v49, %v2215_v37  ;;  %v3024_v45 = vld [vmem:[#allocation6_spill] sm:$0xff]  ;;  %v3025_v42 = vld [vmem:[#allocation8_spill] sm:$0xff]  ;;  %s1665_s29 = sshll.u32 (%p989_p11), %s2045_s28, 12  ;;  %s1495_s15 = sshll.u32 (%p989_p11), %s271_s18, 4  ;;  %s2941_s15 = int_to_ptr.vmem [resolvable:$true] %s1495_s15 }
 0x157   : >> { %1733 = vmatpush3.bf16.msra.mxu0 %v1649_v19  ;;  %1768 = vmatpush3.bf16.msra.mxu1 %v1649_v19  ;;  %vm1028_vm1 = vcmp.lt.s32.totalorder %v2537_v5, 1  ;;  %vm1049_vm2 = vcmp.lt.s32.totalorder %v2537_v5, 7  ;;  %v1060_v9 = vsub.s32 0, %v2537_v5  ;;  %v1080_v47 = vsub.s32 1, %v2537_v5  ;;  %s2937_s14 = scalar_lea.hbm (%p989_p11), %s2993_s7, %s1665_s29  ;;  %s2945_s17 = scalar_lea.sflag (%p989_p11), [#allocation4], %s269_s13 }
 0x158   : >> { %1734 = vmatprep.subr.bf16.mxu0 %v1650_v60  ;;  %1761 = vmatprep.subr.bf16.mxu1 %v1650_v60  ;;  %v1100_v56 = vsub.s32 2, %v2537_v5  ;;  %s1908_s19 = scalar_lea.vmem (%p989_p11), %s2941_s15, 4096  ;;  %s1981_s28 = smov (%p989_p11), [#allocation3]  }
 0x159   : >> { %v1002_v15 = vld [vmem:[%s2555_s21] sm:$0xff]  ;;  %v1003_v46 = vld [vmem:[%s2555_s21 + $0x8] sm:$0xff]  ;;  %v2560_v40 = vld [vmem:[%s2555_s21 + $0x10] sm:$0xff]  ;;  %v2596_v52 = vrot.slane %v3024_v45, %v1060_v9  ;;  %v2599_v58 = vrot.slane %v3024_v45, %v1080_v47  ;;  %p1909_p12 = scmp.ne.s32.totalorder (%p989_p11), %s2941_s15, %s1908_s19  ;;  %s1912_s20 = sshll.u32 (%p989_p11), %s1981_s28, 4  ;;  %s1913_s20 = int_to_ptr.vmem [resolvable:$false] %s1912_s20 }
 0x15a   : >> { %v2563_v39 = vld [vmem:[%s2555_s21 + $0x58] sm:$0xff]  ;;  %v1014_v54 = vrot.slane %v1002_v15, 7  ;;  %v1015_v38 = vrot.slane %v1003_v46, 7  ;;  %v1037_v7 = vrot.slane %v1002_v15, 1  ;;  %v1038_v59 = vrot.slane %v1003_v46, 1  ;;  %v2573_v36 = vld [vmem:[%s2555_s21 + $0x20] sm:$0xff]  ;;  %p1915_p1 = scmp.lt.s32.totalorder (%p989_p11), %s2941_s15, %s1913_s20 }
 0x15b   : >> { %1735 = vmatpush3.bf16.msra.mxu0 %v1650_v60  ;;  %1769 = vmatpush3.bf16.msra.mxu1 %v1650_v60  ;;  %v2999_v13 = vrot.slane %v2563_v39, 7  ;;  %v1039_v12 = vrot.slane %v2560_v40, 1  ;;  %v2570_v2 = vld [vmem:[%s2555_s21 + $0x18] sm:$0xff]  ;;  %v2581_v6 = vld [vmem:[%s2555_s21 + $0x28] sm:$0xff]  ;;  %v2584_v1 = vld [vmem:[%s2555_s21 + $0x70] sm:$0xff]  ;;  %v1134_v0 = vrot.slane %v2573_v36, 7  ;;  %v2606_v48 = vrot.slane %v3024_v45, %v1100_v56  ;;  %p1910_p13 = pnand (%p989_p11), %p1909_p12, %p2062_p5 }
 0x15c   : >> { %1736 = vmatprep.subr.bf16.mxu0 %v1651_v50  ;;  %1762 = vmatprep.subr.bf16.mxu1 %v1651_v50  ;;  %v1035_v17 = vsel %vm1028_vm1, %v1014_v54, %v1015_v38  ;;  %v1057_v11 = vsel %vm1049_vm2, %v1037_v7, %v1038_v59  ;;  %v2602_v41 = vrot.slane %v2570_v2, 7  ;;  %v2998_v3 = vrot.slane %v2584_v1, 7  ;;  %v2624_v60 = vld [vmem:[%s2555_s21 + $0x30] sm:$0xff]  ;;  %v2648_v9 = vld [vmem:[%s2555_s21 + $0x88] sm:$0xff] }
 0x15d   : >> { %v1036_v16 = vsel %vm1028_vm1, %v2999_v13, %v1014_v54  ;;  %v1056_v18 = vsel %vm1049_vm2, %v1038_v59, %v1039_v12  ;;  %v1153_v51 = vrot.slane %v2570_v2, 1  ;;  %v1063_v8 = vmul.f32 %v2596_v52, %v1035_v17  ;;  %v2635_v54 = vld [vmem:[%s2555_s21 + $0x38] sm:$0xff]  ;;  %v2645_v17 = vld [vmem:[%s2555_s21 + $0x40] sm:$0xff]  ;;  %p1911_p0 = pneg (%p989_p11), %p1910_p13 }
 0x15e   : >> { %v1062_v62 = vmul.f32 %v2596_v52, %v1036_v16  ;;  %v1082_v10 = vmul.f32 %v2599_v58, %v1002_v15  ;;  %v1154_v4 = vrot.slane %v2573_v36, 1  ;;  %v1083_v63 = vmul.f32 %v2599_v58, %v1003_v46 }
 0x15f   : >> { %1737 = vmatpush3.bf16.msra.mxu0 %v1651_v50  ;;  %1770 = vmatpush3.bf16.msra.mxu1 %v1651_v50  ;;  %v1102_v14 = vmul.f32 %v2606_v48, %v1057_v11  ;;  %v1103_v57 = vmul.f32 %v2606_v48, %v1056_v18  ;;  %v2621_v19 = vsel %vm1028_vm1, %v2602_v41, %v1134_v0  ;;  %v1155_v46 = vrot.slane %v2581_v6, 1 }
 0x160   : >> { %1738 = vmatprep.subr.bf16.mxu0 %v1652_v61  ;;  %1763 = vmatprep.subr.bf16.mxu1 %v1652_v61  ;;  %v1070_v50 = vadd.f32 %v3025_v42, %v1062_v62  ;;  %v1071_v49 = vadd.f32 %v3025_v42, %v1063_v8  ;;  %v1152_v15 = vsel %vm1028_vm1, %v2998_v3, %v2602_v41  ;;  %v1175_v7 = vsub.s32 3, %v2537_v5  ;;  %v2696_v3 = vld [vmem:[%s2555_s21 + $0x50] sm:$0xff] }
 0x161   : >> { %v2639_v38 = vsel %vm1049_vm2, %v1153_v51, %v1154_v4  ;;  %v1195_v59 = vsub.s32 4, %v2537_v5  ;;  %v1215_v12 = vsub.s32 5, %v2537_v5  ;;  %v2654_v16 = vsel %vm1049_vm2, %v1154_v4, %v1155_v46 }
 0x162   : >> { %v1090_v47 = vadd.f32 %v1082_v10, %v1070_v50  ;;  %v1248_v18 = vrot.slane %v2624_v60, 7  ;;  %v2658_v11 = vrot.slane %v3024_v45, %v1175_v7  ;;  %v1249_v51 = vrot.slane %v2635_v54, 7  ;;  %v2687_v7 = vld [vmem:[%s2555_s21 + $0x48] sm:$0xff] }
 0x163   : >> { %1739 = vmatpush3.bf16.msra.mxu0 %v1652_v61  ;;  %1771 = vmatpush3.bf16.msra.mxu1 %v1652_v61  ;;  %v1091_v61 = vadd.f32 %v1083_v63, %v1071_v49  ;;  %v2661_v56 = vrot.slane %v3024_v45, %v1195_v59  ;;  %v2664_v0 = vrot.slane %v3024_v45, %v1215_v12  ;;  %v1259_v4 = vrot.slane %v2648_v9, 7 }
 0x164   : >> { %1740 = vmatprep.subr.bf16.mxu0 %v2541_v20  ;;  %1764 = vmatprep.subr.bf16.mxu1 %v2541_v20  ;;  %v1110_v62 = vadd.f32 %v1102_v14, %v1090_v47  ;;  %v1177_v63 = vmul.f32 %v2658_v11, %v1152_v15  ;;  %v1178_v50 = vmul.f32 %v2658_v11, %v2621_v19  ;;  %v1268_v14 = vrot.slane %v2624_v60, 1 }
 0x165   : >> { %v1111_v8 = vadd.f32 %v1103_v57, %v1091_v61  ;;  %v1197_v49 = vmul.f32 %v2570_v2, %v2661_v56  ;;  %v1198_v57 = vmul.f32 %v2573_v36, %v2661_v56  ;;  %v1218_v15 = vmul.f32 %v2664_v0, %v2654_v16 }
 0x166   : >> { %v1269_v46 = vrot.slane %v2635_v54, 1  ;;  %v1185_v59 = vadd.f32 %v1177_v63, %v1110_v62  ;;  %v2691_v47 = vsel %vm1028_vm1, %v1248_v18, %v1249_v51  ;;  %v1267_v61 = vsel %vm1028_vm1, %v1259_v4, %v1248_v18  ;;  %v3026_v4 = vld [vmem:[#allocation7_spill] sm:$0xff] }
 0x167   : >> { %1741 = vmatpush3.bf16.msra.mxu0 %v2541_v20  ;;  %1772 = vmatpush3.bf16.msra.mxu1 %v2541_v20  ;;  %v1217_v20 = vmul.f32 %v2664_v0, %v2639_v38  ;;  %v1186_v12 = vadd.f32 %v1178_v50, %v1111_v8  ;;  %v1270_v44 = vrot.slane %v2645_v17, 1  ;;  %v1290_v10 = vsub.s32 6, %v2537_v5 }
 0x168   : >> { %1742 = vmatprep.subr.bf16.mxu0 %v2545_v21  ;;  %1765 = vmatprep.subr.bf16.mxu1 %v2545_v21  ;;  %v2701_v13 = vsel %vm1049_vm2, %v1268_v14, %v1269_v46  ;;  %v1310_v62 = vsub.s32 7, %v2537_v5  ;;  %v1205_v51 = vadd.f32 %v1197_v49, %v1185_v59  ;;  %v1139_v50 = vrot.slane %v2687_v7, 7 }
 0x169   : >> { %v1206_v8 = vadd.f32 %v1198_v57, %v1186_v12  ;;  %v1332_v63 = vmul.f32 %v3026_v4, %v2701_v13  ;;  %v2714_v14 = vsel %vm1049_vm2, %v1269_v46, %v1270_v44  ;;  %v2717_v55 = vrot.slane %v3024_v45, %v1290_v10 }
 0x16a   : >> { %v1140_v49 = vrot.slane %v2696_v3, 7  ;;  %v1225_v57 = vadd.f32 %v1217_v20, %v1205_v51  ;;  %v1333_v12 = vmul.f32 %v3026_v4, %v2714_v14  ;;  %v3027_v22 = vrot.slane %v2581_v6, 7 }
 0x16b   : >> { %1743 = vmatpush3.bf16.msra.mxu0 %v2545_v21  ;;  %1773 = vmatpush3.bf16.msra.mxu1 %v2545_v21  ;;  %v2720_v21 = vrot.slane %v3024_v45, %v1310_v62  ;;  %v1226_v59 = vadd.f32 %v1218_v15, %v1206_v8  ;;  %v1292_v44 = vmul.f32 %v2717_v55, %v1267_v61  ;;  %v1159_v15 = vrot.slane %v2687_v7, 1 }
 0x16c   : >> { %1744 = vmatprep.subr.bf16.mxu0 %v2549_v53  ;;  %1766 = vmatprep.subr.bf16.mxu1 %v2549_v53  ;;  %v2729_v23 = vsel %vm1028_vm1, %v3027_v22, %v1248_v18  ;;  %v1293_v10 = vmul.f32 %v2717_v55, %v2691_v47  ;;  %v1067_v22 = vmul.f32 %v2691_v47, %v2596_v52  ;;  %v1160_v51 = vrot.slane %v2696_v3, 1 }
 0x16d   : >> { %v1312_v46 = vmul.f32 %v2624_v60, %v2720_v21  ;;  %v1313_v20 = vmul.f32 %v2635_v54, %v2720_v21  ;;  %v1066_v6 = vmul.f32 %v2596_v52, %v2729_v23  ;;  %v1086_v18 = vmul.f32 %v2624_v60, %v2599_v58 }
 0x16e   : >> { %v1300_v61 = vadd.f32 %v1292_v44, %v1225_v57  ;;  %v1301_v62 = vadd.f32 %v1293_v10, %v1226_v59  ;;  %v1075_v24 = vadd.f32 %v3025_v42, %v1067_v22  ;;  %v1106_v25 = vmul.f32 %v2701_v13, %v2606_v48 }
 0x16f   : >> { %1745 = vmatpush3.bf16.msra.mxu0 %v2549_v53  ;;  %1774 = vmatpush3.bf16.msra.mxu1 %v2549_v53  ;;  %v1087_v53 = vmul.f32 %v2635_v54, %v2599_v58  ;;  %v1074_v8 = vadd.f32 %v3025_v42, %v1066_v6  ;;  %v1107_v26 = vmul.f32 %v2714_v14, %v2606_v48  ;;  %v3028_v44 = vrot.slane %v2645_v17, 7 }
 0x170   : >> { %1746 = vmatprep.subr.bf16.mxu0 %v2553_v43  ;;  %1767 = vmatprep.subr.bf16.mxu1 %v2553_v43  ;;  %v1320_v27 = vadd.f32 %v1312_v46, %v1300_v61  ;;  %v1321_v57 = vadd.f32 %v1313_v20, %v1301_v62  ;;  %v2760_v59 = vsel %vm1028_vm1, %v1139_v50, %v1140_v49  ;;  %v1161_v28 = vrot.slane %v2563_v39, 1  ;;  %v2780_v61 = vld [vmem:[%s2555_s21 + $0x60] sm:$0xff]  ;;  %v2783_v62 = vld [vmem:[%s2555_s21 + $0x68] sm:$0xff] }
 0x171   : >> { %v2766_v10 = vsel %vm1028_vm1, %v3028_v44, %v1139_v50  ;;  %v1094_v6 = vadd.f32 %v1086_v18, %v1074_v8  ;;  %v1095_v22 = vadd.f32 %v1087_v53, %v1075_v24  ;;  %v2773_v46 = vsel %vm1049_vm2, %v1159_v15, %v1160_v51 }
 0x172   : >> { %v1340_v49 = vadd.f32 %v1332_v63, %v1320_v27  ;;  %v1341_v20 = vadd.f32 %v1333_v12, %v1321_v57  ;;  %v1181_v17 = vmul.f32 %v2658_v11, %v2766_v10  ;;  %v1182_v50 = vmul.f32 %v2658_v11, %v2760_v59 }
 0x173   : >> { %1747 = vmatpush3.bf16.msra.mxu0 %v2553_v43  ;;  %1775 = vmatpush3.bf16.msra.mxu1 %v2553_v43  ;;  %v1114_v43 = vadd.f32 %v1106_v25, %v1094_v6  ;;  %v1115_v24 = vadd.f32 %v1107_v26, %v1095_v22  ;;  %v2787_v18 = vsel %vm1049_vm2, %v1160_v51, %v1161_v28  ;;  %v1254_v26 = vrot.slane %v2780_v61, 7 }
 0x174   : >> { %v1201_v27 = vmul.f32 %v2687_v7, %v2661_v56  ;;  %v1348_v63 = vpack.c.bf16 %v1341_v20, %v1340_v49  ;;  %v1202_v12 = vmul.f32 %v2696_v3, %v2661_v56  ;;  %v1221_v15 = vmul.f32 %v2664_v0, %v2773_v46 }
 0x175   : >> { %v1222_v53 = vmul.f32 %v2664_v0, %v2787_v18  ;;  %v1189_v8 = vadd.f32 %v1181_v17, %v1114_v43  ;;  %v1190_v25 = vadd.f32 %v1182_v50, %v1115_v24  ;;  %v1255_v28 = vrot.slane %v2783_v62, 7 }
 0x176   : >> { %1748 = vmatprep.mubr.bf16.mxu0 %v1348_v63  ;;  %v1274_v51 = vrot.slane %v2780_v61, 1  ;;  %v1275_v57 = vrot.slane %v2783_v62, 1  ;;  %v1276_v44 = vrot.slane %v2584_v1, 1  ;;  %v1316_v6 = vmul.f32 %v2780_v61, %v2720_v21 }
 0x177   : >> { %v1209_v22 = vadd.f32 %v1201_v27, %v1189_v8  ;;  %v1210_v49 = vadd.f32 %v1202_v12, %v1190_v25  ;;  %v1262_v20 = vsel %vm1028_vm1, %v1254_v26, %v1255_v28  ;;  %v3029_v17 = vrot.slane %v2563_v39, 7 }
 0x178   : >> { %v2812_v43 = vsel %vm1049_vm2, %v1275_v57, %v1276_v44  ;;  %v2816_v24 = vsel %vm1049_vm2, %v1274_v51, %v1275_v57  ;;  %v1297_v27 = vmul.f32 %v2717_v55, %v1262_v20  ;;  %v1317_v39 = vmul.f32 %v2783_v62, %v2720_v21 }
 0x179   : >> { %v1263_v50 = vsel %vm1028_vm1, %v3029_v17, %v1254_v26  ;;  %v1229_v12 = vadd.f32 %v1221_v15, %v1209_v22  ;;  %v1230_v8 = vadd.f32 %v1222_v53, %v1210_v49  ;;  %v1336_v25 = vmul.f32 %v3026_v4, %v2816_v24 }
 0x17a   : >> { %v1296_v63 = vmul.f32 %v2717_v55, %v1263_v50  ;;  %v1337_v26 = vmul.f32 %v3026_v4, %v2812_v43  ;;  %v3030_v28 = vrot.slane %v2560_v40, 7  ;;  %v1065_v57 = vmul.f32 %v2621_v19, %v2596_v52 }
 0x17b   : >> { %v1084_v15 = vmul.f32 %v2570_v2, %v2599_v58  ;;  %v1305_v44 = vadd.f32 %v1297_v27, %v1230_v8  ;;  %v1085_v49 = vmul.f32 %v2573_v36, %v2599_v58  ;;  %v1105_v40 = vmul.f32 %v2654_v16, %v2606_v48 }
 0x17c   : >> { %v1034_v51 = vsel %vm1028_vm1, %v3030_v28, %v2602_v41  ;;  %v1304_v53 = vadd.f32 %v1296_v63, %v1229_v12  ;;  %v1073_v17 = vadd.f32 %v3025_v42, %v1065_v57  ;;  %v1104_v19 = vmul.f32 %v2639_v38, %v2606_v48 }
 0x17d   : >> { %v1064_v22 = vmul.f32 %v2596_v52, %v1034_v51  ;;  %v1325_v41 = vadd.f32 %v1317_v39, %v1305_v44  ;;  %v1179_v63 = vmul.f32 %v2658_v11, %v2729_v23  ;;  %v1180_v27 = vmul.f32 %v2691_v47, %v2658_v11 }
 0x17e   : >> { %v1324_v29 = vadd.f32 %v1316_v6, %v1304_v53  ;;  %v1093_v2 = vadd.f32 %v1085_v49, %v1073_v17  ;;  %v1199_v36 = vmul.f32 %v2624_v60, %v2661_v56  ;;  %v1200_v6 = vmul.f32 %v2635_v54, %v2661_v56 }
 0x17f   : >> { %v1072_v28 = vadd.f32 %v3025_v42, %v1064_v22  ;;  %v1345_v8 = vadd.f32 %v1337_v26, %v1325_v41  ;;  %v1219_v38 = vmul.f32 %v2701_v13, %v2664_v0  ;;  %v1220_v51 = vmul.f32 %v2714_v14, %v2664_v0 }
 0x180   : >> { %v1344_v12 = vadd.f32 %v1336_v25, %v1324_v29  ;;  %v1113_v39 = vadd.f32 %v1105_v40, %v1093_v2  ;;  %v1294_v23 = vmul.f32 %v2717_v55, %v2766_v10  ;;  %v1295_v29 = vmul.f32 %v2717_v55, %v2760_v59 }
 0x181   : >> { %v1092_v16 = vadd.f32 %v1084_v15, %v1072_v28  ;;  %v1314_v60 = vmul.f32 %v2687_v7, %v2720_v21  ;;  %v1315_v54 = vmul.f32 %v2696_v3, %v2720_v21  ;;  %v1334_v13 = vmul.f32 %v3026_v4, %v2773_v46  ;;  %v1645_v28 = vld [vmem:[%s2555_s21 + $0x80] sm:$0xff] }
 0x182   : >> { %v1350_v47 = vpack.c.bf16 %v1345_v8, %v1344_v12  ;;  %v1188_v25 = vadd.f32 %v1180_v27, %v1113_v39  ;;  %v1068_v14 = vmul.f32 %v2766_v10, %v2596_v52  ;;  %v1069_v15 = vmul.f32 %v2760_v59, %v2596_v52  ;;  %v1644_v59 = vld [vmem:[%s2555_s21 + $0x78] sm:$0xff]  ;;  %s1914_s21 = scalar_lea.vmem (%p989_p11), %s1913_s20, 8192 }
 0x183   : >> { %v1112_v57 = vadd.f32 %v1104_v19, %v1092_v16  ;;  %v1088_v53 = vmul.f32 %v2687_v7, %v2599_v58  ;;  %v1089_v44 = vmul.f32 %v2696_v3, %v2599_v58  ;;  %v1335_v49 = vmul.f32 %v3026_v4, %v2787_v18  ;;  %p1916_p2 = scmp.lt.s32.totalorder (%p989_p11), %s1914_s21, %s1908_s19 }
 0x184   : >> { %1752 = vmatprep.mubr.bf16.mxu1 %v1350_v47  ;;  %v1208_v22 = vadd.f32 %v1200_v6, %v1188_v25  ;;  %v1076_v17 = vadd.f32 %v3025_v42, %v1068_v14  ;;  %v1108_v10 = vmul.f32 %v2773_v46, %v2606_v48  ;;  %v1077_v41 = vadd.f32 %v3025_v42, %v1069_v15 }
 0x185   : >> { %v1187_v26 = vadd.f32 %v1179_v63, %v1112_v57  ;;  %v1109_v52 = vmul.f32 %v2787_v18, %v2606_v48  ;;  %v1183_v7 = vmul.f32 %v1263_v50, %v2658_v11  ;;  %v1184_v19 = vmul.f32 %v1262_v20, %v2658_v11  ;;  %p1917_p3 = por (%p989_p11), %p1916_p2, %p1915_p1 }
 0x186   : >> { %v1228_v58 = vadd.f32 %v1220_v51, %v1208_v22  ;;  %v1096_v3 = vadd.f32 %v1088_v53, %v1076_v17  ;;  %v1203_v2 = vmul.f32 %v2780_v61, %v2661_v56  ;;  %v1097_v27 = vadd.f32 %v1089_v44, %v1077_v41  ;;  %v3032_v41 = vld [vmem:[#allocation18_spill] sm:$0xff] }
 0x187   : >> { %v1207_v40 = vadd.f32 %v1199_v36, %v1187_v26  ;;  %v1204_v46 = vmul.f32 %v2783_v62, %v2661_v56  ;;  %v1223_v36 = vmul.f32 %v2816_v24, %v2664_v0  ;;  %v1257_v50 = vrot.slane %v1644_v59, 7  ;;  %p1918_p4 = pnand (%p989_p11), %p1917_p3, %p1911_p0 }
 0x188   : >> { %v1303_v48 = vadd.f32 %v1295_v29, %v1228_v58  ;;  %v1116_v18 = vadd.f32 %v1108_v10, %v1096_v3  ;;  %v1258_v12 = vrot.slane %v1645_v28, 7  ;;  %v1117_v16 = vadd.f32 %v1109_v52, %v1097_v27 }
 0x189   : >> { %v1227_v63 = vadd.f32 %v1219_v38, %v1207_v40  ;;  %v1277_v6 = vrot.slane %v1644_v59, 1  ;;  %v1278_v39 = vrot.slane %v1645_v28, 1  ;;  %v3031_v38 = vrot.slane %v2584_v1, 7 }
 0x18a   : >> { %v1323_v11 = vadd.f32 %v1315_v54, %v1303_v48  ;;  %v1191_v20 = vadd.f32 %v1183_v7, %v1116_v18  ;;  %v1260_v61 = vsel %vm1028_vm1, %v1257_v50, %v1258_v12  ;;  %v1192_v24 = vadd.f32 %v1184_v19, %v1117_v16 }
 0x18b   : >> { %v1302_v8 = vadd.f32 %v1294_v23, %v1227_v63  ;;  %v1261_v56 = vsel %vm1028_vm1, %v3031_v38, %v1257_v50  ;;  %v1224_v51 = vmul.f32 %v2812_v43, %v2664_v0  ;;  %v1279_v23 = vrot.slane %v2648_v9, 1 }
 0x18c   : >> { %v1343_v47 = vadd.f32 %v1335_v49, %v1323_v11  ;;  %v1211_v57 = vadd.f32 %v1203_v2, %v1191_v20  ;;  %v1298_v29 = vmul.f32 %v2717_v55, %v1261_v56  ;;  %v1212_v54 = vadd.f32 %v1204_v46, %v1192_v24 }
 0x18d   : >> { %v1322_v62 = vadd.f32 %v1314_v60, %v1302_v8  ;;  %v1281_v14 = vsel %vm1049_vm2, %v1277_v6, %v1278_v39  ;;  %v1299_v1 = vmul.f32 %v2717_v55, %v1260_v61  ;;  %v1280_v60 = vsel %vm1049_vm2, %v1278_v39, %v1279_v23 }
 0x18e   : >> { %v1231_v26 = vadd.f32 %v1223_v36, %v1211_v57  ;;  %v1318_v0 = vmul.f32 %v1644_v59, %v2720_v21  ;;  %v1232_v9 = vadd.f32 %v1224_v51, %v1212_v54  ;;  %v1319_v15 = vmul.f32 %v1645_v28, %v2720_v21 }
 0x18f   : >> { %v1342_v25 = vadd.f32 %v1334_v13, %v1322_v62  ;;  %v1338_v13 = vmul.f32 %v3026_v4, %v1281_v14  ;;  %v1339_v22 = vmul.f32 %v3026_v4, %v1280_v60 }
 0x190   : >> { %v1306_v53 = vadd.f32 %v1298_v29, %v1231_v26  ;;  %v1307_v44 = vadd.f32 %v1299_v1, %v1232_v9 }
 0x191   : >> { %v1349_v43 = vpack.c.bf16 %v1343_v47, %v1342_v25 }
 0x192   : >> { %v1326_v55 = vadd.f32 %v1318_v0, %v1306_v53  ;;  %v1327_v49 = vadd.f32 %v1319_v15, %v1307_v44 }
 0x193   : >> { %1749 = vmatmul.mubr.bf16.vlgmr.msra.gmra.mrb[0].mxu0 %v1349_v43 }
 0x194   : >> { %v1346_v17 = vadd.f32 %v1338_v13, %v1326_v55  ;;  %v1347_v5 = vadd.f32 %v1339_v22, %v1327_v49 }
 0x196   : >> { %v1351_v10 = vpack.c.bf16 %v1347_v5, %v1346_v17 }
 0x198   : >> { %1753 = vmatmul.mubr.bf16.vlgmr.msra.gmra.mrb[0].mxu1 %v1351_v10 }
 0x266   : >> { %v1750_v40 = vpop.f32.mrb[0].mxu0 }
 0x267   : >> { %v1449_v52 = vadd.f32 %v1750_v40, %v3032_v41  ;;  %v1440_v21 = vpop.f32.mrb[1].mxu0 }
 0x268   : >> { %v1441_v7 = vadd.f32 %v3032_v41, %v1440_v21  ;;  %v1751_v59 = vpop.f32.mrb[2].mxu0 }
 0x269   : >> { %1475 = vst.msk [vmem:[%s1472_s23 + $0x10] sm:$0xff] %vm413_vm0, %v1449_v52  ;;  %v1452_v28 = vadd.f32 %v1751_v59, %v3032_v41  ;;  %v1443_v58 = vpop.f32.mrb[3].mxu0 }
 0x26a   : >> { %1473 = vst.msk [vmem:[%s1472_s23] sm:$0xff] %vm413_vm0, %v1441_v7  ;;  %v1444_v3 = vadd.f32 %v3032_v41, %v1443_v58 }
 0x26b   : >> { %1476 = vst.msk [vmem:[%s1472_s23 + $0x18] sm:$0xff] %vm413_vm0, %v1452_v28  ;;  %v1754_v19 = vpop.f32.mrb[0].mxu1  ;;  %991 = sbr.rel (!%p989_p11) target bundleno = 339 (0x153), region = 96 }
 0x26c   : >> { %1474 = vst.msk [vmem:[%s1472_s23 + $0x8] sm:$0xff] %vm413_vm0, %v1444_v3  ;;  %v1465_v2 = vadd.f32 %v1754_v19, %v3032_v41  ;;  %v1456_v63 = vpop.f32.mrb[1].mxu1 }
 0x26d   : >> { %v1457_v27 = vadd.f32 %v3032_v41, %v1456_v63  ;;  %v1755_v46 = vpop.f32.mrb[2].mxu1 }
 0x26e   : >> { %1479 = vst.msk [vmem:[%s1472_s23 + $0x30] sm:$0xff] %vm413_vm0, %v1465_v2  ;;  %v1468_v36 = vadd.f32 %v1755_v46, %v3032_v41  ;;  %v1459_v48 = vpop.f32.mrb[3].mxu1 }
 0x26f   : >> { %1477 = vst.msk [vmem:[%s1472_s23 + $0x20] sm:$0xff] %vm413_vm0, %v1457_v27  ;;  %v1460_v18 = vadd.f32 %v3032_v41, %v1459_v48 }
 0x270   : >> { %1480 = vst.msk [vmem:[%s1472_s23 + $0x38] sm:$0xff] %vm413_vm0, %v1468_v36 }
 0x271   : >> { %1478 = vst.msk [vmem:[%s1472_s23 + $0x28] sm:$0xff] %vm413_vm0, %v1460_v18 }
 0x272   : > { %1921 = shalt.err (!%p1918_p4)
}
 0x273   : > { %s1922_s13 = scalar_lea.hbm %s2937_s14, 4096  ;;  %s1926_s22 = scalar_lea.hbm %s2993_s7, 8192 }
 0x274   : > { %p1923_p7 = scmp.ne.s32.totalorder %s2937_s14, %s1922_s13  ;;  %p1927_p10 = scmp.lt.u32.totalorder %s2937_s14, %s2993_s7 }
 0x275   : > { %p1928_p11 = scmp.lt.u32.totalorder %s1926_s22, %s1922_s13  ;;  %p1930_p13 = scmp.lt.u32.totalorder %s1922_s13, %s2937_s14 }
 0x276   : > { %p1924_p8 = pnand %p1923_p7, %p2062_p5 }
 0x277   : > { %p1929_p12 = por %p1928_p11, %p1927_p10 }
 0x278   : > { %p1925_p9 = pneg %p1924_p8 }
 0x279   : > { %p1931_p0 = por %p1930_p13, %p1929_p12 }
 0x27b   : > { %p1932_p1 = pnand %p1931_p0, %p1925_p9 }
 0x27d   : > { %1935 = shalt.err (!%p1932_p1)
}
 0x27e   : > { %s1982_s8 = smov 128   ;;  %s1983_s9 = smov 8  }
 0x27f   : > { %1776 = dma.vmem_to_hbm [thread:$0]  (%p2062_p5), %s2941_s15, 4096, %s2937_s14, %s2945_s17, %s1982_s8, %s1982_s8, %s1983_s9  }
 0x280 PF: > { %p1782_p2 = scmp.ge.s32.totalorder %s1974_s27, 2  ;;  %s1510_s19 = sand.u32 1, %s1962_s24  }
 0x281   : > { %s1511_s28 = scalar_lea.sflag [#allocation4], %s1510_s19 }
 0x282   : > { %p1779_p3 = pnand %p1782_p2, %p2066_p6 }
 0x284   : > { %1957 = dma.done.wait (!%p1779_p3), %s1511_s28, 4096  }
 0x285   : > { %1959 = vsyncadd (!%p1779_p3), %s1511_s28, 4294963200  ;;  %p17_p4 = scmp.ge.s32.totalorder %s2049_s30, 4   ;;  %s3033_s24 = smov %s1966_s25 }
 0x286   : > { %s3034_s25 = smov %s1970_s26  ;;  %s3035_s26 = smov %s2060_s10 }
 0x287   : > { %s3036_s27 = smov %s2049_s30  ;;  %19 = sbr.rel (!%p17_p4) target bundleno = 3 (0x3), region = 107 }
 0x28e   :  { %1516 = vsyncpa [#allocation4], 1 }
 0x28f   :  { %1518 = vsyncpa [#allocation4 + $0x1], 1 }

</bundles_post_ra>
